<compile_context>
chip_gen: v7x
topology: tpu7x:2x2x1
jax: 0.10.0
libtpu: 0.0.40
codegen_flags: <defaults>
</compile_context>

<pallas_src>
import functools
from types import SimpleNamespace

import jax
import jax.numpy as jnp
import numpy as np
from jax.experimental import pallas as pl
from jax.experimental.pallas import tpu as pltpu


# ----------------------------------------------------------------------------
# Fused Pallas kernel: whole SIREN network for one tile of N coordinates
# ----------------------------------------------------------------------------
def _fused_siren_kernel(x_ref, *refs, layer_dims, fma_threshold=8):
    """refs = (w_0, b_0, w_1, b_1, ..., w_{L-1}, b_{L-1}, o_ref).

    x_ref: (dim_in, TILE_N)        lane-dense over N
    w_l  : (dout_l, din_l)         w0 already folded in for sine layers
    b_l  : (dout_l, 1)             w0 already folded in for sine layers
    o_ref: (dim_out, TILE_N)
    """
    num_layers = len(layer_dims)
    o_ref = refs[-1]
    h = x_ref[...].astype(jnp.float32)                     # (din, TILE_N)

    for l, (din_l, dout_l) in enumerate(layer_dims):
        w = refs[2 * l][...]                               # (dout_l, din_l)
        b = refs[2 * l + 1][...]                           # (dout_l, 1)
        if din_l <= fma_threshold:
            # Tiny contraction dim: lane-dense VPU broadcast-FMAs, skip the MXU.
            y = b
            for k in range(din_l):
                y = y + w[:, k:k + 1] * h[k:k + 1, :]      # (dout_l,1)*(1,TILE_N)
        else:
            y = jnp.dot(w, h, preferred_element_type=jnp.float32) + b
        if l < num_layers - 1:
            y = jnp.sin(y)                                 # Sine(w0): w0 folded into w, b
        h = y

    o_ref[...] = h.astype(o_ref.dtype)


# ----------------------------------------------------------------------------
# Wrapper: pad N, transpose to lane-dense layout, fold w0, one pallas_call
# ----------------------------------------------------------------------------
def siren_forward(x, params, *, tile_n=128):
    """x: (N, dim_in) f32; params: list of (W(dout,din), b(dout,), act_w0, apply_sine).

    Returns (N, dim_out) f32, matching the PyTorch siren.forward semantics.
    """
    n, dim_in = x.shape
    num_tiles = int(pl.cdiv(n, tile_n))
    n_pad = num_tiles * tile_n

    xp = x.astype(jnp.float32)
    if n_pad != n:
        xp = jnp.pad(xp, ((0, n_pad - n), (0, 0)))
    x_t = xp.T                                             # (dim_in, n_pad), N on lanes

    kernel_args = []
    layer_dims = []
    for (W, b, act_w0, apply_sine) in params:
        dout, din = W.shape
        layer_dims.append((din, dout))
        if apply_sine:
            # sin(w0 * (W @ h + b)) == sin((w0*W) @ h + w0*b)  -- forward-only fold
            Wk = (act_w0 * W).astype(jnp.float32)
            bk = (act_w0 * b).astype(jnp.float32)
        else:
            Wk = W.astype(jnp.float32)
            bk = b.astype(jnp.float32)
        kernel_args.append(Wk)
        kernel_args.append(bk.reshape(dout, 1))

    dim_out = layer_dims[-1][1]

    # x tile streams over the grid; weights/biases are small resident constants
    # (constant block index -> fetched once, kept in VMEM).
    in_specs = [pl.BlockSpec((dim_in, tile_n), lambda i: (0, i))]
    for (din_l, dout_l) in layer_dims:
        in_specs.append(pl.BlockSpec((dout_l, din_l), lambda i: (0, 0)))
        in_specs.append(pl.BlockSpec((dout_l, 1), lambda i: (0, 0)))

    kernel = functools.partial(_fused_siren_kernel, layer_dims=tuple(layer_dims))

    out_t = pl.pallas_call(
        kernel,
        out_shape=jax.ShapeDtypeStruct((dim_out, n_pad), jnp.float32),
        grid=(num_tiles,),
        in_specs=in_specs,
        out_specs=pl.BlockSpec((dim_out, tile_n), lambda i: (0, i)),
        compiler_params=pltpu.CompilerParams(
            dimension_semantics=("parallel",),
        ),
    )(x_t, *kernel_args)

    return out_t.T[:n]                                     # back to (N, dim_out)


# ----------------------------------------------------------------------------
# Parameter init (mirrors siren.__init__ / SirenLayer.__init__)
# ----------------------------------------------------------------------------
def init_siren_params(key, cfg, dim_in=2, dim_out=3, c=6.0, siren_layer_default_w0=30.0):
    """Returns list of (W (dout,din), b (dout,), activation_w0, apply_sine).

    In the PyTorch module every hidden SirenLayer receives activation=Sine(cfg.network.w0)
    explicitly, so the ACTIVATION always uses cfg.network.w0 (w0_initial only enters the
    first layer's init, which uses 1/dim_in regardless).  The final layer uses SirenLayer's
    default w0=30.0 for its init std and Identity activation (final_act=None).
    """
    dim_hidden = cfg.network.layer_size
    num_layers = cfg.network.num_layers
    w0 = cfg.network.w0
    w0_initial = cfg.network.w0_initial

    params = []
    for ind in range(num_layers - 1):
        is_first = ind == 0
        layer_w0 = w0_initial if is_first else w0
        layer_dim_in = dim_in if is_first else dim_hidden
        w_std = (1.0 / layer_dim_in) if is_first else (np.sqrt(c / layer_dim_in) / layer_w0)
        key, kw, kb = jax.random.split(key, 3)
        W = jax.random.uniform(kw, (dim_hidden, layer_dim_in),
                               minval=-w_std, maxval=w_std, dtype=jnp.float32)
        b = jax.random.uniform(kb, (dim_hidden,),
                               minval=-w_std, maxval=w_std, dtype=jnp.float32)
        params.append((W, b, w0, True))

    # Final layer: Linear + Identity (final_act=None).
    w_std = np.sqrt(c / dim_hidden) / siren_layer_default_w0
    key, kw, kb = jax.random.split(key, 3)
    W = jax.random.uniform(kw, (dim_out, dim_hidden),
                           minval=-w_std, maxval=w_std, dtype=jnp.float32)
    b = jax.random.uniform(kb, (dim_out,),
                           minval=-w_std, maxval=w_std, dtype=jnp.float32)
    params.append((W, b, 1.0, False))
    return params


# Pure-JAX reference (un-folded math, matches the PyTorch forward)
def siren_forward_ref(x, params):
    out = x
    for (W, b, act_w0, apply_sine) in params:
        out = out @ W.T + b
        if apply_sine:
            out = jnp.sin(act_w0 * out)
    return out


if __name__ == "__main__":
    # cfg equivalent to the PyTorch module's cfg.network.*
    cfg = SimpleNamespace(network=SimpleNamespace(
        layer_size=32, num_layers=3, w0=30.0, w0_initial=30.0, final_act=None))

    dim_in, dim_out = 2, 3

    key = jax.random.PRNGKey(0)
    kx, kp = jax.random.split(key)

    # Input: flattened 16x16 coordinate grid -> 256 coords of dim 2.
    N = 256
    x = jax.random.uniform(kx, (N, dim_in), minval=-1.0, maxval=1.0,
                           dtype=jnp.float32)

    params = init_siren_params(kp, cfg, dim_in=dim_in, dim_out=dim_out)

    out = siren_forward(x, params, tile_n=128)   # grid = 2 parallel tiles (megacore-friendly)
    out = jax.block_until_ready(out)

    ref = siren_forward_ref(x, params)
    np.testing.assert_allclose(np.asarray(out), np.asarray(ref), rtol=1e-4, atol=1e-4)

    print("KERNEL_OK")
</pallas_src>

<mosaic_0001>
module attributes {stable_mosaic.version = 11 : i64} {
  func.func @_fused_siren_kernel(%arg0: i32, %arg1: memref<2x128xf32, #tpu.memory_space<vmem>>, %arg2: memref<32x2xf32, #tpu.memory_space<vmem>>, %arg3: memref<32x1xf32, #tpu.memory_space<vmem>>, %arg4: memref<32x32xf32, #tpu.memory_space<vmem>>, %arg5: memref<32x1xf32, #tpu.memory_space<vmem>>, %arg6: memref<3x32xf32, #tpu.memory_space<vmem>>, %arg7: memref<3x1xf32, #tpu.memory_space<vmem>>, %arg8: memref<3x128xf32, #tpu.memory_space<vmem>>) attributes {dimension_semantics = [#tpu.dimension_semantics<parallel>], iteration_bounds = array<i64: 2>, scalar_prefetch = 0 : i64, scratch_operands = 0 : i64, tpu.core_type = #tpu.core_type<tc>, window_params = [{transform_indices = @transform_0, window_bounds = array<i64: 2, 128>}, {pipeline_mode = #tpu.pipeline_mode<synchronous>, transform_indices = @transform_1, window_bounds = array<i64: 32, 2>}, {pipeline_mode = #tpu.pipeline_mode<synchronous>, transform_indices = @transform_2, window_bounds = array<i64: 32, 1>}, {pipeline_mode = #tpu.pipeline_mode<synchronous>, transform_indices = @transform_3, window_bounds = array<i64: 32, 32>}, {pipeline_mode = #tpu.pipeline_mode<synchronous>, transform_indices = @transform_4, window_bounds = array<i64: 32, 1>}, {pipeline_mode = #tpu.pipeline_mode<synchronous>, transform_indices = @transform_5, window_bounds = array<i64: 3, 32>}, {pipeline_mode = #tpu.pipeline_mode<synchronous>, transform_indices = @transform_6, window_bounds = array<i64: 3, 1>}, {transform_indices = @transform_7, window_bounds = array<i64: 3, 128>}]} {
    %c0 = arith.constant 0 : index
    %c0_0 = arith.constant 0 : index
    %0 = vector.load %arg1[%c0, %c0_0] : memref<2x128xf32, #tpu.memory_space<vmem>>, vector<2x128xf32>
    %c0_1 = arith.constant 0 : index
    %c0_2 = arith.constant 0 : index
    %1 = vector.load %arg2[%c0_1, %c0_2] : memref<32x2xf32, #tpu.memory_space<vmem>>, vector<32x2xf32>
    %c0_3 = arith.constant 0 : index
    %c0_4 = arith.constant 0 : index
    %2 = vector.load %arg3[%c0_3, %c0_4] : memref<32x1xf32, #tpu.memory_space<vmem>>, vector<32x1xf32>
    %3 = vector.extract_strided_slice %1 {offsets = [0, 0], sizes = [32, 1], strides = [1, 1]} : vector<32x2xf32> to vector<32x1xf32>
    %4 = vector.extract_strided_slice %0 {offsets = [0, 0], sizes = [1, 128], strides = [1, 1]} : vector<2x128xf32> to vector<1x128xf32>
    %5 = vector.broadcast %3 : vector<32x1xf32> to vector<32x128xf32>
    %6 = vector.broadcast %4 : vector<1x128xf32> to vector<32x128xf32>
    %7 = arith.mulf %5, %6 : vector<32x128xf32>
    %8 = vector.broadcast %2 : vector<32x1xf32> to vector<32x128xf32>
    %9 = arith.addf %8, %7 : vector<32x128xf32>
    %10 = vector.extract_strided_slice %1 {offsets = [0, 1], sizes = [32, 1], strides = [1, 1]} : vector<32x2xf32> to vector<32x1xf32>
    %11 = vector.extract_strided_slice %0 {offsets = [1, 0], sizes = [1, 128], strides = [1, 1]} : vector<2x128xf32> to vector<1x128xf32>
    %12 = vector.broadcast %10 : vector<32x1xf32> to vector<32x128xf32>
    %13 = vector.broadcast %11 : vector<1x128xf32> to vector<32x128xf32>
    %14 = arith.mulf %12, %13 : vector<32x128xf32>
    %15 = arith.addf %9, %14 : vector<32x128xf32>
    %16 = math.sin %15 : vector<32x128xf32>
    %c0_5 = arith.constant 0 : index
    %c0_6 = arith.constant 0 : index
    %17 = vector.load %arg4[%c0_5, %c0_6] : memref<32x32xf32, #tpu.memory_space<vmem>>, vector<32x32xf32>
    %c0_7 = arith.constant 0 : index
    %c0_8 = arith.constant 0 : index
    %18 = vector.load %arg5[%c0_7, %c0_8] : memref<32x1xf32, #tpu.memory_space<vmem>>, vector<32x1xf32>
    %cst = arith.constant dense<0.000000e+00> : vector<32x128xf32>
    %19 = tpu.matmul %17, %16, %cst {dimension_numbers = #tpu.dot_dimension_numbers<[1], [0], [0], [1], [0, 0, 1, 1], [], []>} : vector<32x32xf32>, vector<32x128xf32>, vector<32x128xf32> -> vector<32x128xf32>
    %20 = vector.broadcast %18 : vector<32x1xf32> to vector<32x128xf32>
    %21 = arith.addf %19, %20 : vector<32x128xf32>
    %22 = math.sin %21 : vector<32x128xf32>
    %c0_9 = arith.constant 0 : index
    %c0_10 = arith.constant 0 : index
    %23 = vector.load %arg6[%c0_9, %c0_10] : memref<3x32xf32, #tpu.memory_space<vmem>>, vector<3x32xf32>
    %c0_11 = arith.constant 0 : index
    %c0_12 = arith.constant 0 : index
    %24 = vector.load %arg7[%c0_11, %c0_12] : memref<3x1xf32, #tpu.memory_space<vmem>>, vector<3x1xf32>
    %cst_13 = arith.constant dense<0.000000e+00> : vector<3x128xf32>
    %25 = tpu.matmul %23, %22, %cst_13 {dimension_numbers = #tpu.dot_dimension_numbers<[1], [0], [0], [1], [0, 0, 1, 1], [], []>} : vector<3x32xf32>, vector<32x128xf32>, vector<3x128xf32> -> vector<3x128xf32>
    %26 = vector.broadcast %24 : vector<3x1xf32> to vector<3x128xf32>
    %27 = arith.addf %25, %26 : vector<3x128xf32>
    %c0_14 = arith.constant 0 : index
    %c0_15 = arith.constant 0 : index
    %28 = vector.load %arg8[%c0_14, %c0_15] : memref<3x128xf32, #tpu.memory_space<vmem>>, vector<3x128xf32>
    tpu.vector_store %arg8[%c0_14, %c0_15], %27 {strides = array<i32>} : memref<3x128xf32, #tpu.memory_space<vmem>>, vector<3x128xf32>,
    return
  }
  func.func @transform_0(%arg0: i32) -> (i32, i32) {
    %c0_i32 = arith.constant 0 : i32
    %c0_i32_0 = arith.constant 0 : i32
    return %c0_i32, %arg0 : i32, i32
  }
  func.func @transform_1(%arg0: i32) -> (i32, i32) {
    %c0_i32 = arith.constant 0 : i32
    %c0_i32_0 = arith.constant 0 : i32
    %c0_i32_1 = arith.constant 0 : i32
    return %c0_i32, %c0_i32_0 : i32, i32
  }
  func.func @transform_2(%arg0: i32) -> (i32, i32) {
    %c0_i32 = arith.constant 0 : i32
    %c0_i32_0 = arith.constant 0 : i32
    %c0_i32_1 = arith.constant 0 : i32
    return %c0_i32, %c0_i32_0 : i32, i32
  }
  func.func @transform_3(%arg0: i32) -> (i32, i32) {
    %c0_i32 = arith.constant 0 : i32
    %c0_i32_0 = arith.constant 0 : i32
    %c0_i32_1 = arith.constant 0 : i32
    return %c0_i32, %c0_i32_0 : i32, i32
  }
  func.func @transform_4(%arg0: i32) -> (i32, i32) {
    %c0_i32 = arith.constant 0 : i32
    %c0_i32_0 = arith.constant 0 : i32
    %c0_i32_1 = arith.constant 0 : i32
    return %c0_i32, %c0_i32_0 : i32, i32
  }
  func.func @transform_5(%arg0: i32) -> (i32, i32) {
    %c0_i32 = arith.constant 0 : i32
    %c0_i32_0 = arith.constant 0 : i32
    %c0_i32_1 = arith.constant 0 : i32
    return %c0_i32, %c0_i32_0 : i32, i32
  }
  func.func @transform_6(%arg0: i32) -> (i32, i32) {
    %c0_i32 = arith.constant 0 : i32
    %c0_i32_0 = arith.constant 0 : i32
    %c0_i32_1 = arith.constant 0 : i32
    return %c0_i32, %c0_i32_0 : i32, i32
  }
  func.func @transform_7(%arg0: i32) -> (i32, i32) {
    %c0_i32 = arith.constant 0 : i32
    %c0_i32_0 = arith.constant 0 : i32
    return %c0_i32, %arg0 : i32, i32
  }
}

</mosaic_0001>

<bundles_post_ra>
// kernel: tpu_custom_call.1
= control target key start
LH: loop header
LB: loop body
LE: loop exit
PB: predicated region body
PF: predicated region fallthrough
CT: control target
= control target key end

     0   :  { %12 = vsyncpa [#allocation3], 0  ;;  %s2611_s0 = inlined_call_operand.vmem [shape: f32[2,256], index: 0, kind: input, shape index: {}]   ;;  %s2612_s1 = inlined_call_operand.vmem [shape: f32[32,2], index: 1, kind: input, shape index: {}]   ;;  %s2613_s2 = inlined_call_operand.vmem [shape: f32[32,1], index: 2, kind: input, shape index: {}]   ;;  %s2614_s3 = inlined_call_operand.vmem [shape: f32[32,32], index: 3, kind: input, shape index: {}]   ;;  %s2615_s4 = inlined_call_operand.vmem [shape: f32[32,1], index: 4, kind: input, shape index: {}]   ;;  %s2616_s5 = inlined_call_operand.vmem [shape: f32[3,32], index: 5, kind: input, shape index: {}]   ;;  %s2617_s6 = inlined_call_operand.vmem [shape: f32[3,1], index: 6, kind: input, shape index: {}]   ;;  %s2618_s7 = inlined_call_operand.hbm [shape: f32[3,256], index: 7, kind: output, shape index: {}]  }
   0x1   :  { %14 = vsyncpa [#allocation3 + $0x1], 0  ;;  %s1812_s24 = smov 0   ;;  %s1814_s25 = smov 0  }
   0x2   :  { %s1816_s26 = smov 0   ;;  %s1818_s27 = smov 0  }
   0x3 LB: > { %s1833_s28 = sadd.s32 4294967295, %s1758_s27   ;;  %s1475_s29 = sadd.s32 4294967294, %s1758_s27   ;;  %s1758_s27 = sphi %s1818_s27, %s2636_s27   ;;  %s1754_s26 = sphi %s1816_s26, %s2635_s26   ;;  %s1750_s25 = sphi %s1814_s25, %s2634_s25   ;;  %s1746_s24 = sphi %s1812_s24, %s2633_s24  }
   0x4   : > { %s1837_s30 = sadd.s32 1, %s1758_s27   ;;  %s179_s8 = sadd.s32 1, %s1754_s26 }
   0x5   : > { %s176_s9 = ssub.s32 %s1758_s27, %s1837_s30  ;;  %p189_p0 = scmp.ne.s32.totalorder %s1754_s26, %s1750_s25 }
   0x6   : > { %p177_p1 = scmp.eq.s32.totalorder %s176_s9, 0  ;;  %p190_p2 = scmp.eq.s32.totalorder %s1833_s28, 1 }
   0x7   : > { %p195_p3 = scmp.ne.s32.totalorder %s1750_s25, %s1746_s24  ;;  %p196_p4 = scmp.eq.s32.totalorder %s1475_s29, 1 }
   0x8   : > { %s1848_s10 = scalar_select %p177_p1, %s1754_s26, %s179_s8  }
   0x9   : > { %p1850_p5 = por %p190_p2, %p189_p0  ;;  %p1854_p6 = por %p196_p4, %p195_p3 }
   0xa   : > { %p1478_p7 = scmp.ge.s32.totalorder %s1758_s27, 1  ;;  %p239_p8 = scmp.lt.s32.totalorder %s1758_s27, 3 }
   0xc   : > { %p240_p9 = pnand %p1478_p7, %p239_p8 }
   0xd   : > { %v279_v0 = vld [vmem:[%s2613_s2] sm:$0xff] (!%p240_p9)  ;;  %v1760_v2 = vmov (!%p240_p9), 0   ;;  %v280_v3 = vld [vmem:[%s2613_s2 + $0x8] sm:$0xff] (!%p240_p9)  ;;  %v278_v5 = vld [vmem:[%s2612_s1 + $0x18] sm:$0xff] (!%p240_p9)  ;;  %v1761_v6 = vmov (!%p240_p9), 1   ;;  %p270_p10 = scmp.lt.s32.totalorder (!%p240_p9), %s1833_s28, 1  ;;  %v303_v10 = vlaneseq (!%p240_p9) }
   0xe   : > { %243 = sbr.rel (%p240_p9) target bundleno = 866 (0x362), region = 48  ;;  %v275_v1 = vld [vmem:[%s2612_s1] sm:$0xff] (!%p240_p9)  ;;  %1657 = vset.pattern.permute.xlu1 (!%p240_p9), %v1760_v2  ;;  %1656 = vset.pattern.permute.xlu0 (!%p240_p9), %v1760_v2  ;;  %v276_v4 = vld [vmem:[%s2612_s1 + $0x8] sm:$0xff] (!%p240_p9)  ;;  %v277_v7 = vld [vmem:[%s2612_s1 + $0x10] sm:$0xff] (!%p240_p9)  ;;  %vm807_vm1 = vcmask (!%p240_p9), 261120   ;;  %s267_s9 = sand.u32 (!%p240_p9), 1, %s1750_s25  }
   0xf   : > { %313 = vperm.xlu1 (!%p240_p9), %1657, %v279_v0   ;;  %285 = vperm.xlu0 (!%p240_p9), %1656, %v275_v1   ;;  %v281_v8 = vld [vmem:[%s2613_s2 + $0x10] sm:$0xff] (!%p240_p9)  ;;  %v282_v9 = vld [vmem:[%s2613_s2 + $0x18] sm:$0xff] (!%p240_p9)  ;;  %v304_v11 = vshrl.u32 (!%p240_p9), %v303_v10, 7  ;;  %v779_v48 = vld [vmem:[%s2614_s3] sm:$0xff] (!%p240_p9)  ;;  %s1479_s13 = sshll.u32 (!%p240_p9), %s267_s9, 2  ;;  %s1519_s14 = sshll.u32 (!%p240_p9), %s1833_s28, 6 }
  0x10   : > { %1543 = vmatprep.mubr.msk.f32.mxu0 (!%p240_p9), %vm807_vm1, %v779_v48  ;;  %s1403_s20 = scalar_lea.sflag (!%p240_p9), [#allocation3], %s267_s9 }
  0x11   : > { %v305_v13 = vsub.s32 (!%p240_p9), 0, %v304_v11  ;;  %v353_v16 = vsub.s32 (!%p240_p9), 1, %v304_v11 }
  0x13   : > { %318 = vperm.xlu1 (!%p240_p9), %1657, %v280_v3   ;;  %290 = vperm.xlu0 (!%p240_p9), %1656, %v276_v4  }
  0x15   : > { %s271_s15 = scalar_select %p270_p10, %s1833_s28, 1 }
  0x16   : > { %s1771_s28 = smov [#allocation2]  }
  0x17   : > { %1658 = vset.pattern.permute.xlu1 %v1761_v6  ;;  %300 = vperm.xlu0 %1656, %v278_v5   ;;  %s1480_s16 = sshll.u32 %s271_s15, 1  ;;  %s269_s15 = scalar_lea.vmem [#allocation2], %s1479_s13 }
  0x18   : > { %340 = vperm.xlu1 %1658, %v276_v4   ;;  %s273_s19 = scalar_lea.vmem %s2611_s0, %s1480_s16  ;;  %v783_v4 = vld [vmem:[%s2615_s4] sm:$0xff]  ;;  %s1416_s16 = sshll.u32 %s269_s15, 4  ;;  %s2571_s16 = int_to_ptr.vmem [resolvable:$true] %s1416_s16 }
  0x19   : > { %v274_v15 = vld [vmem:[%s273_s19] sm:$0x3]  ;;  %s2569_s19 = scalar_lea.hbm %s2618_s7, %s1519_s14  ;;  %s1696_s21 = scalar_lea.vmem %s2571_s16, 64 }
  0x1a   : > { %v306_v17 = vrot.slane %v274_v15, %v305_v13  ;;  %v354_v21 = vrot.slane %v274_v15, %v353_v16  ;;  %v1762_v13 = vmov 2102212464   ;;  %v1763_v15 = vmov 920167782   ;;  %p1697_p11 = scmp.ne.s32.totalorder %s2571_s16, %s1696_s21  ;;  %s1700_s22 = sshll.u32 %s1771_s28, 4  ;;  %s1701_s22 = int_to_ptr.vmem [resolvable:$false] %s1700_s22 }
  0x1b   : > { %1660 = vset.pattern.permute.xlu0 %v1761_v6  ;;  %s1702_s23 = scalar_lea.vmem %s1701_s22, 128  ;;  %p1703_p0 = scmp.lt.s32.totalorder %s2571_s16, %s1701_s22 }
  0x1c   : > { %1659 = vset.pattern.permute.xlu1 %v1760_v2  ;;  %336 = vperm.xlu0 %1660, %v275_v1   ;;  %p1698_p12 = pnand %p1697_p11, %p1850_p5  ;;  %p1704_p1 = scmp.lt.s32.totalorder %s1702_s23, %s1696_s21 }
  0x1d   : > { %295 = vperm.xlu1 %1659, %v277_v7  }
  0x1e   : > { %p1699_p13 = pneg %p1698_p12  ;;  %p1705_p2 = por %p1704_p1, %p1703_p0 }
  0x20   : > { %344 = vperm.xlu0 %1660, %v277_v7   ;;  %v784_v7 = vld [vmem:[%s2615_s4 + $0x8] sm:$0xff]  ;;  %p1706_p3 = pnand %p1705_p2, %p1699_p13 }
  0x21   : > { %323 = vperm.xlu1 %1659, %v281_v8  }
  0x24   : > { %1663 = vset.pattern.permute.xlu0 %v1760_v2 }
  0x25   : > { %328 = vperm.xlu1 %1659, %v282_v9   ;;  %794 = vperm.xlu0 %1663, %v784_v7  }
  0x29   : > { %1661 = vset.pattern.permute.xlu1 %v1761_v6 }
  0x2a   : > { %348 = vperm.xlu1 %1661, %v278_v5  }
  0x2e   : > { %1662 = vset.pattern.permute.xlu1 %v1760_v2 }
  0x2f   : > { %789 = vperm.xlu1 %1662, %v783_v4  }
  0x8e   : > { %v314_v12 = vpop.permute.xlu1 %313  ;;  %v286_v14 = vpop.permute.xlu0 %285 }
  0x8f   : > { %v307_v24 = vmul.f32 %v306_v17, %v286_v14 }
  0x91   : > { %v331_v29 = vadd.f32 %v314_v12, %v307_v24  ;;  %v785_v12 = vld [vmem:[%s2615_s4 + $0x10] sm:$0xff] }
  0x92   : > { %v319_v18 = vpop.permute.xlu1 %318  ;;  %v291_v19 = vpop.permute.xlu0 %290  ;;  %799 = vperm.xlu1 %1662, %v785_v12  }
  0x93   : > { %v308_v20 = vmul.f32 %v306_v17, %v291_v19 }
  0x95   : > { %v332_v25 = vadd.f32 %v319_v18, %v308_v20  ;;  %v1322_v18 = vld [vmem:[%s2617_s6] sm:$0x7] }
  0x96   : > { %v301_v22 = vpop.permute.xlu0 %300  ;;  %1325 = vperm.xlu0 %1663, %v1322_v18  }
  0x97   : > { %v341_v23 = vpop.permute.xlu1 %340  ;;  %v310_v56 = vmul.f32 %v306_v17, %v301_v22 }
  0x98   : > { %v356_v26 = vmul.f32 %v354_v21, %v341_v23 }
  0x9a   : > { %v1889_v27 = vadd.f32 %v356_v26, %v332_v25 }
  0x9b   : > { %v337_v28 = vpop.permute.xlu0 %336 }
  0x9c   : > { %v470_v30 = vand.u32 2139095040, %v1889_v27  ;;  %v355_v31 = vmul.f32 %v354_v21, %v337_v28  ;;  %v296_v32 = vpop.permute.xlu1 %295  ;;  %v467_v61 = vand.u32 2147483647, %v1889_v27  ;;  %v1764_v28 = vmov 1326507024  }
  0x9d   : > { %v309_v35 = vmul.f32 %v306_v17, %v296_v32  ;;  %v1765_v32 = vmov 683565275  }
  0x9e   : > { %v471_v33 = vshrl.u32 %v470_v30, 23  ;;  %v1892_v34 = vadd.f32 %v355_v31, %v331_v29  ;;  %v1933_v11 = vand.u32 8388607, %v467_v61 }
  0x9f   : > { %v345_v36 = vpop.permute.xlu0 %344 }
  0xa0   : > { %v1485_v37 = vadd.s32 4294967169, %v471_v33  ;;  %v366_v38 = vand.u32 2139095040, %v1892_v34  ;;  %v324_v39 = vpop.permute.xlu1 %323  ;;  %v357_v40 = vmul.f32 %v354_v21, %v345_v36  ;;  %v363_v42 = vand.u32 2147483647, %v1892_v34 }
  0xa1   : > { %v333_v41 = vadd.f32 %v324_v39, %v309_v35  ;;  %v786_v35 = vld [vmem:[%s2615_s4 + $0x18] sm:$0xff] }
  0xa2   : > { %v477_v43 = vadd.s32 1, %v1485_v37  ;;  %v367_v44 = vshrl.u32 %v366_v38, 23  ;;  %v370_v52 = vand.u32 8388607, %v363_v42  ;;  %804 = vperm.xlu1 %1662, %v786_v35  }
  0xa3   : > { %v1896_v45 = vadd.f32 %v357_v40, %v333_v41  ;;  %v1766_v40 = vmov 2475754826  }
  0xa4   : > { %vm478_vm0 = vcmp.gt.s32.totalorder %v477_v43, 0  ;;  %v1481_v46 = vadd.s32 4294967169, %v367_v44  ;;  %v329_v47 = vpop.permute.xlu1 %328  ;;  %v371_v60 = vor.u32 8388608, %v370_v52 }
  0xa5   : > { %v479_v49 = vsel %vm478_vm0, %v477_v43, 0  ;;  %v571_v50 = vand.u32 2147483647, %v1896_v45  ;;  %v574_v51 = vand.u32 2139095040, %v1896_v45  ;;  %v334_v0 = vadd.f32 %v329_v47, %v310_v56 }
  0xa6   : > { %v1906_v53 = vand.u32 31, %v479_v49  ;;  %v373_v54 = vadd.s32 1, %v1481_v46  ;;  %v1924_v8 = vshrl.u32 %v479_v49, 5  ;;  %v1929_v10 = vshll.u32 %v371_v60, 8 }
  0xa7   : > { %v575_v55 = vshrl.u32 %v574_v51, 23  ;;  %v578_v57 = vand.u32 8388607, %v571_v50  ;;  %v1767_v43 = vmov 2131351028  }
  0xa8   : > { %vm374_vm2 = vcmp.gt.s32.totalorder %v373_v54, 0  ;;  %v1912_v62 = vsub.s32 32, %v1906_v53  ;;  %v1940_v14 = vshll.u32 %v1762_v13, %v1906_v53  ;;  %v1948_v17 = vshll.u32 %v1763_v15, %v1906_v53 }
  0xa9   : > { %v1489_v58 = vadd.s32 4294967169, %v575_v55  ;;  %v349_v59 = vpop.permute.xlu1 %348  ;;  %v375_v63 = vsel %vm374_vm2, %v373_v54, 0  ;;  %v579_v5 = vor.u32 8388608, %v578_v57 }
  0xaa   : > { %v358_v1 = vmul.f32 %v354_v21, %v349_v59  ;;  %v1914_v2 = vand.u32 31, %v375_v63  ;;  %v1944_v16 = vshrl.u32 %v1763_v15, %v1912_v62  ;;  %v1953_v19 = vshrl.u32 %v375_v63, 5 }
  0xab   : > { %v581_v3 = vadd.s32 1, %v1489_v58  ;;  %v1964_v26 = vshll.u32 %v579_v5, 8 }
  0xac   : > { %v1919_v6 = vadd.f32 %v358_v1, %v334_v0  ;;  %v1927_v9 = vsub.s32 32, %v1914_v2  ;;  %v389_v23 = vshll.u32 %v1762_v13, %v1914_v2  ;;  %v1962_v24 = vshll.u32 %v1763_v15, %v1914_v2 }
  0xad   : > { %vm582_vm3 = vcmp.gt.s32.totalorder %v581_v3, 0  ;;  %vm398_vm4 = vcmp.lt.s32.totalorder %v1953_v19, 4  ;;  %vm395_vm15 = vcmp.lt.s32.totalorder %v1953_v19, 1  ;;  %vm396_vm0 = vcmp.lt.s32.totalorder %v1953_v19, 2 }
  0xae   : > { %v390_v20 = vshrl.u32 %v1763_v15, %v1927_v9  ;;  %v583_v21 = vsel %vm582_vm3, %v581_v3, 0  ;;  %v675_v22 = vand.u32 2147483647, %v1919_v6  ;;  %v393_v29 = vshrl.u32 %v1764_v28, %v1927_v9 }
  0xaf   : > { %v585_v25 = vand.u32 31, %v583_v21  ;;  %v584_v30 = vshrl.u32 %v583_v21, 5  ;;  %v678_v31 = vand.u32 2139095040, %v1919_v6  ;;  %v1971_v33 = vshrl.u32 %v1765_v32, %v1927_v9 }
  0xb0   : > { %v1976_v36 = vor.u32 %v390_v20, %v389_v23  ;;  %v682_v39 = vand.u32 8388607, %v675_v22  ;;  %v394_v20 = vor.u32 %v393_v29, %v1962_v24  ;;  %v380_v29 = vshll.u32 %v1765_v32, %v1914_v2 }
  0xb1   : > { %v586_v37 = vsub.s32 32, %v585_v25  ;;  %v588_v38 = vshll.u32 %v1765_v32, %v585_v25  ;;  %v591_v41 = vshll.u32 %v1766_v40, %v585_v25  ;;  %v594_v44 = vshll.u32 %v1767_v43, %v585_v25 }
  0xb2   : > { %v597_v46 = vshll.u32 %v1762_v13, %v585_v25  ;;  %v600_v47 = vshll.u32 %v1763_v15, %v585_v25  ;;  %vm603_vm5 = vcmp.lt.s32.totalorder %v584_v30, 1  ;;  %vm604_vm6 = vcmp.lt.s32.totalorder %v584_v30, 2 }
  0xb3   : > { %v587_v48 = vshrl.u32 %v1765_v32, %v586_v37  ;;  %v589_v49 = vshrl.u32 %v1766_v40, %v586_v37  ;;  %v592_v51 = vshrl.u32 %v1767_v43, %v586_v37  ;;  %v595_v52 = vshrl.u32 %v1762_v13, %v586_v37 }
  0xb4   : > { %v598_v54 = vshrl.u32 %v1763_v15, %v586_v37  ;;  %v601_v55 = vshrl.u32 %v1764_v28, %v586_v37  ;;  %vm605_vm7 = vcmp.lt.s32.totalorder %v584_v30, 3  ;;  %vm606_vm8 = vcmp.lt.s32.totalorder %v584_v30, 4 }
  0xb5   : > { %v590_v56 = vor.u32 %v589_v49, %v588_v38  ;;  %v593_v57 = vor.u32 %v592_v51, %v591_v41  ;;  %v596_v58 = vor.u32 %v595_v52, %v594_v44  ;;  %v679_v63 = vshrl.u32 %v678_v31, 23 }
  0xb6   : > { %v599_v59 = vor.u32 %v598_v54, %v597_v46  ;;  %v602_v60 = vor.u32 %v601_v55, %v600_v47  ;;  %v683_v37 = vor.u32 8388608, %v682_v39  ;;  %v2011_v24 = vsel %vm398_vm4, %v1976_v36, 920167782 }
  0xb7   : > { %v607_v0 = vsel %vm603_vm5, %v587_v48, %v590_v56  ;;  %v608_v1 = vsel %vm606_vm8, %v596_v58, 2102212464  ;;  %v611_v3 = vsel %vm603_vm5, %v590_v56, %v593_v57  ;;  %v615_v4 = vsel %vm603_vm5, %v593_v57, %v596_v58 }
  0xb8   : > { %v609_v5 = vsel %vm605_vm7, %v593_v57, %v608_v1  ;;  %v612_v7 = vsel %vm606_vm8, %v599_v59, 920167782  ;;  %v616_v12 = vsel %vm606_vm8, %v602_v60, 1326507024  ;;  %v1493_v18 = vadd.s32 4294967169, %v679_v63 }
  0xb9   : > { %v610_v21 = vsel %vm604_vm6, %v607_v0, %v609_v5  ;;  %v613_v23 = vsel %vm605_vm7, %v596_v58, %v612_v7  ;;  %v617_v25 = vsel %vm605_vm7, %v599_v59, %v616_v12  ;;  %v381_v30 = vshrl.u32 %v1766_v40, %v1927_v9 }
  0xba   : > { %v614_v35 = vsel %vm604_vm6, %v611_v3, %v613_v23  ;;  %v618_v31 = vsel %vm604_vm6, %v615_v4, %v617_v25  ;;  %v685_v38 = vadd.s32 1, %v1493_v18  ;;  %v2019_v39 = vsel %vm398_vm4, %v394_v20, 1326507024 }
  0xbb   : > { %v2000_v41 = vmul.u32.u64.low %v1964_v26, %v618_v31  ;;  %v2001_v44 = vmul.u32.u64.high %v1964_v26, %v618_v31, %v2000_v41  ;;  %v2004_v46 = vmul.u32.u64.low %v1964_v26, %v614_v35  ;;  %v2005_v47 = vmul.u32.u64.high %v1964_v26, %v614_v35, %v2004_v46 }
  0xbc   : > { %vm686_vm9 = vcmp.gt.s32.totalorder %v685_v38, 0  ;;  %v626_v48 = vmul.u32 %v1964_v26, %v610_v21  ;;  %v384_v51 = vshrl.u32 %v1767_v43, %v1927_v9  ;;  %v2024_v54 = vshll.u32 %v683_v37, 8 }
  0xbd   : > { %v687_v49 = vsel %vm686_vm9, %v685_v38, 0  ;;  %v383_v55 = vshll.u32 %v1766_v40, %v1914_v2  ;;  %v386_v56 = vshll.u32 %v1767_v43, %v1914_v2  ;;  %vm628_vm10 = vc.u32 %v2001_v44, %v2004_v46 }
  0xbe   : > { %v689_v52 = vand.u32 31, %v687_v49  ;;  %v629_v57 = vadd.s32 1, %v2005_v47  ;;  %v688_v58 = vshrl.u32 %v687_v49, 5  ;;  %v387_v26 = vshrl.u32 %v1762_v13, %v1927_v9 }
  0xbf   : > { %v382_v63 = vor.u32 %v381_v30, %v380_v29  ;;  %v385_v0 = vor.u32 %v384_v51, %v383_v55  ;;  %vm397_vm2 = vcmp.lt.s32.totalorder %v1953_v19, 3  ;;  %vm502_vm3 = vcmp.lt.s32.totalorder %v1924_v8, 4 }
  0xc0   : > { %v690_v59 = vsub.s32 32, %v689_v52  ;;  %v692_v60 = vshll.u32 %v1765_v32, %v689_v52  ;;  %v630_v1 = vsel %vm628_vm10, %v629_v57, %v2005_v47  ;;  %v695_v3 = vshll.u32 %v1766_v40, %v689_v52 }
  0xc1   : > { %v698_v2 = vshll.u32 %v1767_v43, %v689_v52  ;;  %v701_v4 = vshll.u32 %v1762_v13, %v689_v52  ;;  %v631_v5 = vadd.s32 %v630_v1, %v626_v48  ;;  %v704_v9 = vshll.u32 %v1763_v15, %v689_v52 }
  0xc2   : > { %v693_v7 = vshrl.u32 %v1766_v40, %v690_v59  ;;  %v696_v12 = vshrl.u32 %v1767_v43, %v690_v59  ;;  %v699_v18 = vshrl.u32 %v1762_v13, %v690_v59  ;;  %v702_v20 = vshrl.u32 %v1763_v15, %v690_v59 }
  0xc3   : > { %v705_v21 = vshrl.u32 %v1764_v28, %v690_v59  ;;  %vm707_vm11 = vcmp.lt.s32.totalorder %v688_v58, 1  ;;  %v632_v23 = vadd.s32 536870912, %v631_v5  ;;  %v691_v25 = vshrl.u32 %v1765_v32, %v690_v59 }
  0xc4   : > { %v694_v35 = vor.u32 %v693_v7, %v692_v60  ;;  %v697_v31 = vor.u32 %v696_v12, %v695_v3  ;;  %v700_v37 = vor.u32 %v699_v18, %v698_v2  ;;  %v703_v38 = vor.u32 %v702_v20, %v701_v4 }
  0xc5   : > { %v706_v41 = vor.u32 %v705_v21, %v704_v9  ;;  %vm708_vm12 = vcmp.lt.s32.totalorder %v688_v58, 2  ;;  %v2047_v47 = vshrl.u32 %v632_v23, 30  ;;  %vm709_vm13 = vcmp.lt.s32.totalorder %v688_v58, 3 }
  0xc6   : > { %vm710_vm14 = vcmp.lt.s32.totalorder %v688_v58, 4  ;;  %v715_v29 = vsel %vm707_vm11, %v694_v35, %v697_v31  ;;  %v719_v49 = vsel %vm707_vm11, %v697_v31, %v700_v37  ;;  %v388_v59 = vor.u32 %v387_v26, %v386_v56 }
  0xc7   : > { %v712_v30 = vsel %vm710_vm14, %v700_v37, 2102212464  ;;  %v716_v48 = vsel %vm710_vm14, %v703_v38, 920167782  ;;  %v720_v51 = vsel %vm710_vm14, %v706_v41, 1326507024  ;;  %v711_v60 = vsel %vm707_vm11, %v691_v25, %v694_v35 }
  0xc8   : > { %v634_v52 = vshll.u32 %v2047_v47, 30  ;;  %v717_v55 = vsel %vm709_vm13, %v700_v37, %v716_v48  ;;  %v721_v57 = vsel %vm709_vm13, %v703_v38, %v720_v51  ;;  %v713_v4 = vsel %vm709_vm13, %v697_v31, %v712_v30 }
  0xc9   : > { %v718_v1 = vsel %vm708_vm12, %v715_v29, %v717_v55  ;;  %v722_v3 = vsel %vm708_vm12, %v719_v49, %v721_v57  ;;  %v400_v26 = vsel %vm398_vm4, %v388_v59, 2102212464  ;;  %v405_v20 = vsel %vm397_vm2, %v388_v59, %v2011_v24 }
  0xca   : > { %v2058_v2 = vsub.s32 %v631_v5, %v634_v52  ;;  %v2062_v7 = vmul.u32.u64.low %v2024_v54, %v722_v3  ;;  %v2063_v12 = vmul.u32.u64.high %v2024_v54, %v722_v3, %v2062_v7  ;;  %v403_v5 = vsel %vm395_vm15, %v382_v63, %v385_v0 }
  0xcb   : > { %v2066_v9 = vmul.u32.u64.low %v2024_v54, %v718_v1  ;;  %v2067_v18 = vmul.u32.u64.high %v2024_v54, %v718_v1, %v2066_v9  ;;  %v714_v21 = vsel %vm708_vm12, %v711_v60, %v713_v4  ;;  %v406_v23 = vsel %vm396_vm0, %v403_v5, %v405_v20 }
  0xcc   : > { %v637_v56 = vsub.s32 0, %v2058_v2  ;;  %v407_v25 = vsel %vm395_vm15, %v385_v0, %v388_v59  ;;  %v409_v35 = vsel %vm397_vm2, %v1976_v36, %v2019_v39  ;;  %v399_v24 = vsel %vm395_vm15, %v1971_v33, %v382_v63 }
  0xcd   : > { %vm732_vm4 = vc.u32 %v2063_v12, %v2066_v9  ;;  %v401_v58 = vsel %vm397_vm2, %v385_v0, %v400_v26  ;;  %v733_v37 = vadd.s32 1, %v2067_v18  ;;  %v410_v38 = vsel %vm396_vm0, %v407_v25, %v409_v35 }
  0xce   : > { %v1490_v31 = vmin.u32 %v637_v56, %v2058_v2  ;;  %v2096_v41 = vmul.u32.u64.low %v1929_v10, %v406_v23  ;;  %v2097_v29 = vmul.u32.u64.high %v1929_v10, %v406_v23, %v2096_v41  ;;  %v497_v36 = vshrl.u32 %v1764_v28, %v1912_v62 }
  0xcf   : > { %v730_v39 = vmul.u32 %v2024_v54, %v714_v21  ;;  %v2104_v30 = vmul.u32.u64.low %v1929_v10, %v410_v38  ;;  %v2105_v48 = vmul.u32.u64.high %v1929_v10, %v410_v38, %v2104_v30  ;;  %v734_v33 = vsel %vm732_vm4, %v733_v37, %v2067_v18 }
  0xd0   : > { %v402_v63 = vsel %vm396_vm0, %v399_v24, %v401_v58  ;;  %v485_v0 = vshrl.u32 %v1766_v40, %v1912_v62  ;;  %v488_v49 = vshrl.u32 %v1767_v43, %v1912_v62  ;;  %v495_v51 = vor.u32 %v1944_v16, %v1940_v14 }
  0xd1   : > { %v639_v52 = vclz %v1490_v31  ;;  %v735_v54 = vadd.s32 %v734_v33, %v730_v39  ;;  %v491_v55 = vshrl.u32 %v1762_v13, %v1912_v62  ;;  %v421_v57 = vadd.s32 1, %v2097_v29 }
  0xd2   : > { %v484_v19 = vshll.u32 %v1765_v32, %v1906_v53  ;;  %v487_v59 = vshll.u32 %v1766_v40, %v1906_v53  ;;  %v490_v60 = vshll.u32 %v1767_v43, %v1906_v53  ;;  %v498_v1 = vor.u32 %v497_v36, %v1948_v17 }
  0xd3   : > { %v736_v3 = vadd.s32 536870912, %v735_v54  ;;  %v418_v14 = vmul.u32 %v1929_v10, %v402_v63  ;;  %vm420_vm5 = vc.u32 %v2105_v48, %v2096_v41  ;;  %v508_v56 = vsel %vm502_vm3, %v495_v51, 920167782 }
  0xd4   : > { %v422_v16 = vsel %vm420_vm5, %v421_v57, %v2097_v29  ;;  %v486_v4 = vor.u32 %v485_v0, %v484_v19  ;;  %v489_v7 = vor.u32 %v488_v49, %v487_v59  ;;  %v492_v18 = vor.u32 %v491_v55, %v490_v60 }
  0xd5   : > { %v1491_v26 = vadd.s32 4294967294, %v639_v52  ;;  %v2132_v5 = vshrl.u32 %v736_v3, 30  ;;  %v475_v53 = vor.u32 8388608, %v1933_v11  ;;  %v423_v17 = vadd.s32 %v422_v16, %v418_v14 }
  0xd6   : > { %v512_v10 = vsel %vm502_vm3, %v498_v1, 1326507024  ;;  %vm499_vm6 = vcmp.lt.s32.totalorder %v1924_v8, 1  ;;  %vm501_vm7 = vcmp.lt.s32.totalorder %v1924_v8, 3  ;;  %vm500_vm9 = vcmp.lt.s32.totalorder %v1924_v8, 2 }
  0xd7   : > { %v738_v20 = vshll.u32 %v2132_v5, 30  ;;  %v424_v21 = vadd.s32 536870912, %v423_v17  ;;  %v507_v23 = vsel %vm499_vm6, %v486_v4, %v489_v7  ;;  %v509_v25 = vsel %vm501_vm7, %v492_v18, %v508_v56 }
  0xd8   : > { %vm1492_vm8 = vcmp.lt.s32.totalorder %v1491_v26, 0  ;;  %v515_v11 = vshll.u32 %v475_v53, 8  ;;  %v510_v24 = vsel %vm500_vm9, %v507_v23, %v509_v25  ;;  %v511_v58 = vsel %vm499_vm6, %v489_v7, %v492_v18 }
  0xd9   : > { %v739_v35 = vsub.s32 %v735_v54, %v738_v20  ;;  %v2145_v31 = vshrl.u32 %v424_v21, 30  ;;  %v513_v37 = vsel %vm501_vm7, %v495_v51, %v512_v10  ;;  %v483_v29 = vshrl.u32 %v1765_v32, %v1912_v62 }
  0xda   : > { %v504_v36 = vsel %vm502_vm3, %v492_v18, 2102212464  ;;  %v514_v39 = vsel %vm500_vm9, %v511_v58, %v513_v37  ;;  %v642_v30 = vsel %vm1492_vm8, 0, %v1491_v26  ;;  %v731_v53 = vadd.s32 %v2066_v9, %v2063_v12 }
  0xdb   : > { %v741_v38 = vsub.s32 0, %v739_v35  ;;  %v426_v33 = vshll.u32 %v2145_v31, 30  ;;  %v2160_v63 = vmul.u32.u64.low %v515_v11, %v514_v39  ;;  %v2161_v0 = vmul.u32.u64.high %v515_v11, %v514_v39, %v2160_v63 }
  0xdc   : > { %v2163_v52 = vmul.u32.u64.low %v515_v11, %v510_v24  ;;  %v2164_v54 = vmul.u32.u64.high %v515_v11, %v510_v24, %v2163_v52  ;;  %v503_v62 = vsel %vm499_vm6, %v483_v29, %v486_v4  ;;  %v505_v55 = vsel %vm501_vm7, %v489_v7, %v504_v36 }
  0xdd   : > { %v1494_v49 = vmin.u32 %v741_v38, %v739_v35  ;;  %v427_v51 = vsub.s32 %v423_v17, %v426_v33  ;;  %v647_v57 = vsub.s32 4294967266, %v642_v30  ;;  %v506_v1 = vsel %vm500_vm9, %v503_v62, %v505_v55 }
  0xde   : > { %vm524_vm10 = vc.u32 %v2161_v0, %v2163_v52  ;;  %v525_v3 = vadd.s32 1, %v2164_v54  ;;  %v522_v7 = vmul.u32 %v515_v11, %v506_v1  ;;  %v643_v26 = vsub.s32 32, %v642_v30 }
  0xdf   : > { %v743_v19 = vclz %v1494_v49  ;;  %v429_v59 = vsub.s32 0, %v427_v51  ;;  %v648_v16 = vadd.s32 127, %v647_v57  ;;  %v627_v8 = vadd.s32 %v2004_v46, %v2001_v44 }
  0xe0   : > { %v526_v4 = vsel %vm524_vm10, %v525_v3, %v2164_v54  ;;  %v419_v11 = vadd.s32 %v2096_v41, %v2105_v48  ;;  %v644_v63 = vshll.u32 %v2058_v2, %v642_v30  ;;  %vm677_vm13 = vcmp.lt.s32.totalorder %v1919_v6, 0 }
  0xe1   : > { %v1495_v60 = vadd.s32 4294967294, %v743_v19  ;;  %v1482_v14 = vmin.u32 %v429_v59, %v427_v51  ;;  %v527_v21 = vadd.s32 %v526_v4, %v522_v7  ;;  %v649_v23 = vshll.u32 %v648_v16, 23 }
  0xe2   : > { %v645_v38 = vshrl.u32 %v627_v8, %v643_v26  ;;  %vm365_vm15 = vcmp.lt.s32.totalorder %v1892_v34, 0  ;;  %vm2193_vm0 = vcmp.le.f32.partialorder %v675_v22, 0.7853982  ;;  %vm573_vm2 = vcmp.lt.s32.totalorder %v1896_v45, 0 }
  0xe3   : > { %vm1496_vm11 = vcmp.lt.s32.totalorder %v1495_v60, 0  ;;  %v431_v56 = vclz %v1482_v14  ;;  %v528_v37 = vadd.s32 536870912, %v527_v21  ;;  %v650_v44 = vor.u32 4788187, %v649_v23 }
  0xe4   : > { %v746_v18 = vsel %vm1496_vm11, 0, %v1495_v60  ;;  %v646_v55 = vor.u32 %v645_v38, %v644_v63  ;;  %v523_v23 = vadd.s32 %v2163_v52, %v2161_v0  ;;  %vm2204_vm3 = vcmp.le.f32.partialorder %v363_v42, 0.7853982 }
  0xe5   : > { %v747_v17 = vsub.s32 32, %v746_v18  ;;  %v751_v10 = vsub.s32 4294967266, %v746_v18  ;;  %v1483_v20 = vadd.s32 4294967294, %v431_v56  ;;  %v748_v58 = vshll.u32 %v739_v35, %v746_v18 }
  0xe6   : > { %v2183_v33 = vshrl.u32 %v528_v37, 30  ;;  %v651_v60 = vand.u32 2147483647, %v650_v44  ;;  %v653_v16 = vcvt.s32.f32 %v646_v55  ;;  %vm2218_vm4 = vcmp.le.f32.partialorder %v571_v50, 0.7853982 }
  0xe7   : > { %v749_v25 = vshrl.u32 %v731_v53, %v747_v17  ;;  %v752_v24 = vadd.s32 127, %v751_v10  ;;  %vm1484_vm12 = vcmp.lt.s32.totalorder %v1483_v20, 0  ;;  %v657_v50 = vsub.s32 4, %v2047_v47 }
  0xe8   : > { %v434_v36 = vsel %vm1484_vm12, 0, %v1483_v20  ;;  %v530_v62 = vshll.u32 %v2183_v33, 30  ;;  %v654_v18 = vmul.f32 %v653_v16, %v651_v60  ;;  %vm469_vm5 = vcmp.lt.s32.totalorder %v1889_v27, 0 }
  0xe9   : > { %v753_v29 = vshll.u32 %v752_v24, 23  ;;  %v750_v12 = vor.u32 %v749_v25, %v748_v58  ;;  %v435_v9 = vsub.s32 32, %v434_v36  ;;  %v439_v39 = vsub.s32 4294967266, %v434_v36 }
  0xea   : > { %v436_v49 = vshll.u32 %v427_v51, %v434_v36  ;;  %v531_v48 = vsub.s32 %v527_v21, %v530_v62  ;;  %v655_v17 = vxor.u32 2147483648, %v654_v18  ;;  %vm468_vm6 = vcmp.le.f32.partialorder %v467_v61, 0.7853982 }
  0xeb   : > { %v754_v46 = vor.u32 4788187, %v753_v29  ;;  %v437_v54 = vshrl.u32 %v419_v11, %v435_v9  ;;  %v440_v35 = vadd.s32 127, %v439_v39  ;;  %v757_v19 = vcvt.s32.f32 %v750_v12 }
  0xec   : > { %v533_v14 = vsub.s32 0, %v531_v48  ;;  %v656_v37 = vsel %vm573_vm2, %v655_v17, %v654_v18  ;;  %v449_v11 = vsub.s32 4, %v2145_v31  ;;  %v761_v39 = vsub.s32 4, %v2132_v5 }
  0xed   : > { %v755_v57 = vand.u32 2147483647, %v754_v46  ;;  %v438_v59 = vor.u32 %v437_v54, %v436_v49  ;;  %v441_v41 = vshll.u32 %v440_v35, 23  ;;  %v659_v9 = vsel %vm2218_vm4, %v1896_v45, %v656_v37 }
  0xee   : > { %v1486_v30 = vmin.u32 %v533_v14, %v531_v48  ;;  %v450_v44 = vsel %vm365_vm15, %v449_v11, %v2145_v31  ;;  %v553_v54 = vsub.s32 4, %v2183_v33  ;;  %v762_v35 = vsel %vm677_vm13, %v761_v39, %v2132_v5 }
  0xef   : > { %v758_v1 = vmul.f32 %v757_v19, %v755_v57  ;;  %v442_v3 = vor.u32 4788187, %v441_v41  ;;  %v445_v2 = vcvt.s32.f32 %v438_v59  ;;  %v452_v55 = vsel %vm2204_vm3, 0, %v450_v44 }
  0xf0   : > { %v535_v7 = vclz %v1486_v30  ;;  %v658_v57 = vsel %vm573_vm2, %v657_v50, %v2047_v47  ;;  %v764_v19 = vsel %vm2193_vm0, 0, %v762_v35  ;;  %v554_v59 = vsel %vm469_vm5, %v553_v54, %v2183_v33  ;;  %v790_v54 = vpop.permute.xlu1 %789 }
  0xf1   : > { %v443_v4 = vand.u32 2147483647, %v442_v3  ;;  %v759_v51 = vxor.u32 2147483648, %v758_v1  ;;  %v660_v60 = vsel %vm2218_vm4, 0, %v658_v57  ;;  %v768_v3 = vadd.s32 3, %v764_v19 }
  0xf2   : > { %v1487_v53 = vadd.s32 4294967294, %v535_v7  ;;  %v556_v16 = vsel %vm468_vm6, 0, %v554_v59  ;;  %vm767_vm4 = vweird.f32 %v1919_v6 }
  0xf3   : > { %v446_v56 = vmul.f32 %v445_v2, %v443_v4  ;;  %v760_v10 = vsel %vm677_vm13, %v759_v51, %v758_v1  ;;  %v664_v2 = vadd.s32 3, %v660_v60  ;;  %v560_v51 = vadd.s32 3, %v556_v16 }
  0xf4   : > { %vm1488_vm14 = vcmp.lt.s32.totalorder %v1487_v53, 0  ;;  %v763_v22 = vsel %vm2193_vm0, %v1919_v6, %v760_v10  ;;  %v780_v6 = vld [vmem:[%s2614_s3 + $0x8] sm:$0xff] }
  0xf5   : > { %v447_v26 = vxor.u32 2147483648, %v446_v56  ;;  %v538_v20 = vsel %vm1488_vm14, 0, %v1487_v53  ;;  %1664 = vcosq.f32 %v763_v22  ;;  %v665_v17 = vand.u32 3, %v664_v2 }
  0xf6   : > { %v539_v25 = vsub.s32 32, %v538_v20  ;;  %v543_v24 = vsub.s32 4294967266, %v538_v20  ;;  %v540_v38 = vshll.u32 %v531_v48, %v538_v20  ;;  %1666 = vsinq.f32 %v763_v22 }
  0xf7   : > { %v448_v8 = vsel %vm365_vm15, %v447_v26, %v446_v56  ;;  %v456_v48 = vadd.s32 3, %v452_v55  ;;  %v769_v56 = vand.u32 3, %v768_v3  ;;  %v561_v21 = vand.u32 3, %v560_v51 }
  0xf8   : > { %v541_v29 = vshrl.u32 %v523_v23, %v539_v25  ;;  %v544_v0 = vadd.s32 127, %v543_v24  ;;  %v451_v52 = vsel %vm2204_vm3, %v1892_v34, %v448_v8  ;;  %vm667_vm11 = vcmp.eq.s32.totalorder %v665_v17, 0 }
  0xf9   : > { %1668 = vcosq.f32 %v451_v52  ;;  %v457_v30 = vand.u32 3, %v456_v48  ;;  %vm771_vm9 = vcmp.eq.s32.totalorder %v769_v56, 0  ;;  %vm774_vm10 = vcmp.eq.s32.totalorder %v769_v56, 2 }
  0xfa   : > { %v542_v36 = vor.u32 %v541_v29, %v540_v38  ;;  %v545_v12 = vshll.u32 %v544_v0, 23  ;;  %1670 = vsinq.f32 %v451_v52  ;;  %vm670_vm12 = vcmp.eq.s32.totalorder %v665_v17, 2 }
  0xfb   : > { %1672 = vcosq.f32 %v659_v9  ;;  %vm459_vm7 = vcmp.eq.s32.totalorder %v457_v30, 0  ;;  %vm462_vm8 = vcmp.eq.s32.totalorder %v457_v30, 2  ;;  %vm458_vm13 = vcmp.lt.s32.totalorder %v457_v30, 2 }
  0xfc   : > { %v546_v63 = vor.u32 4788187, %v545_v12  ;;  %v549_v49 = vcvt.s32.f32 %v542_v36  ;;  %1674 = vsinq.f32 %v659_v9  ;;  %vm770_vm14 = vcmp.lt.s32.totalorder %v769_v56, 2 }
  0xfd   : > { %vm455_vm15 = vweird.f32 %v1892_v34  ;;  %vm566_vm0 = vcmp.eq.s32.totalorder %v561_v21, 2  ;;  %vm666_vm2 = vcmp.lt.s32.totalorder %v665_v17, 2  ;;  %vm563_vm3 = vcmp.eq.s32.totalorder %v561_v21, 0 }
  0xfe   : > { %v547_v46 = vand.u32 2147483647, %v546_v63 }
  0xff   : > { %v1665_v41 = vpop.eup %1664 }
 0x100   : > { %v550_v62 = vmul.f32 %v549_v49, %v547_v46  ;;  %v1667_v1 = vpop.eup %1666  ;;  %v775_v53 = vxor.u32 2147483648, %v1665_v41  ;;  %v781_v49 = vld [vmem:[%s2614_s3 + $0x10] sm:$0xff] }
 0x101   : > { %v772_v26 = vxor.u32 2147483648, %v1667_v1 }
 0x102   : > { %v551_v31 = vxor.u32 2147483648, %v550_v62  ;;  %v776_v24 = vsel %vm774_vm10, %v775_v53, %v1667_v1 }
 0x103   : > { %v1669_v14 = vpop.eup %1668  ;;  %v773_v25 = vsel %vm771_vm9, %v1665_v41, %v772_v26 }
 0x104   : > { %v552_v5 = vsel %vm469_vm5, %v551_v31, %v550_v62  ;;  %v1671_v4 = vpop.eup %1670  ;;  %v463_v7 = vxor.u32 2147483648, %v1669_v14  ;;  %v777_v52 = vsel %vm770_vm14, %v773_v25, %v776_v24  ;;  %vm562_vm5 = vcmp.lt.s32.totalorder %v561_v21, 2  ;;  %v795_v62 = vpop.permute.xlu0 %794 }
 0x105   : > { %v555_v47 = vsel %vm468_vm6, %v1889_v27, %v552_v5  ;;  %v1673_v33 = vpop.eup %1672  ;;  %v460_v61 = vxor.u32 2147483648, %v1671_v4  ;;  %v778_v39 = vsel %vm767_vm4, nan, %v777_v52  ;;  %vm559_vm6 = vweird.f32 %v1889_v27  ;;  %v782_v27 = vld [vmem:[%s2614_s3 + $0x18] sm:$0xff] }
 0x106   : > { %1676 = vcosq.f32 %v555_v47  ;;  %v1675_v18 = vpop.eup %1674  ;;  %v671_v20 = vxor.u32 2147483648, %v1673_v33  ;;  %v464_v23 = vsel %vm462_vm8, %v463_v7, %v1671_v4 }
 0x107   : > { %1678 = vsinq.f32 %v555_v47  ;;  %v668_v10 = vxor.u32 2147483648, %v1675_v18  ;;  %v461_v8 = vsel %vm459_vm7, %v1669_v14, %v460_v61  ;;  %vm663_vm7 = vweird.f32 %v1896_v45 }
 0x108   : > { %v672_v37 = vsel %vm670_vm12, %v671_v20, %v1675_v18  ;;  %v465_v29 = vsel %vm458_vm13, %v461_v8, %v464_v23  ;;  %v1768_v45 = vmov 0.0|0.0  }
 0x109   : > { %v669_v22 = vsel %vm667_vm11, %v1673_v33, %v668_v10  ;;  %v466_v12 = vsel %vm455_vm15, nan, %v465_v29  ;;  %1568 = vmatprep.subr.bf16.mxu1 %v1768_v45 }
 0x10a   : > { %v673_v36 = vsel %vm666_vm2, %v669_v22, %v672_v37 }
 0x10b   : > { %v674_v44 = vsel %vm663_vm7, nan, %v673_v36 }
 0x10c   : > { %v1564_v46 = vpack.c.bf16 %v778_v39, %v674_v44 }
 0x110   : > { %v1677_v58 = vpop.eup %1676 }
 0x111   : > { %v1679_v38 = vpop.eup %1678  ;;  %v567_v0 = vxor.u32 2147483648, %v1677_v58  ;;  %v800_v35 = vpop.permute.xlu1 %799 }
 0x112   : > { %v564_v42 = vxor.u32 2147483648, %v1679_v38 }
 0x113   : > { %v568_v11 = vsel %vm566_vm0, %v567_v0, %v1679_v38 }
 0x114   : > { %v565_v9 = vsel %vm563_vm3, %v1677_v58, %v564_v42 }
 0x115   : > { %v569_v63 = vsel %vm562_vm5, %v565_v9, %v568_v11 }
 0x116   : > { %v570_v50 = vsel %vm559_vm6, nan, %v569_v63 }
 0x117   : > { %v1560_v34 = vpack.c.bf16 %v570_v50, %v466_v12 }
 0x119   : > { %1561 = vmatprep.subr.bf16.mxu0 %v1560_v34 }
 0x11a   : > { %1563 = vmatpush3.bf16.msra.mxu0 %v1560_v34 }
 0x11b   : > { %1565 = vmatprep.subr.bf16.mxu0 %v1564_v46 }
 0x11e   : > { %1567 = vmatpush3.bf16.msra.mxu0 %v1564_v46 }
 0x121   : > { %1544 = vmatmul.mubr.msk.f32.vlgmr.msra.gmra.mrb[0].mxu0 %vm807_vm1, %v780_v6  ;;  %v805_v48 = vpop.permute.xlu1 %804 }
 0x122   : > { %1546 = vmatprep.mubr.msk.f32.mxu0 %vm807_vm1, %v781_v49 }
 0x125   : > { %1547 = vmatmul.mubr.msk.f32.gmra.mrb[2].mxu0 %vm807_vm1, %v782_v27 }
 0x1f4   : > { %v1545_v55 = vpop.f32.mrb[0].mxu0 }
 0x1f5   : > { %v2266_v57 = vadd.f32 %v1545_v55, %v795_v62  ;;  %v886_v31 = vpop.f32.mrb[1].mxu0 }
 0x1f6   : > { %v2268_v19 = vadd.f32 %v886_v31, %v790_v54 }
 0x1f7   : > { %v1009_v59 = vand.u32 2147483647, %v2266_v57  ;;  %v1012_v41 = vand.u32 2139095040, %v2266_v57 }
 0x1f8   : > { %v905_v5 = vand.u32 2147483647, %v2268_v19  ;;  %v908_v60 = vand.u32 2139095040, %v2268_v19  ;;  %v1548_v1 = vpop.f32.mrb[2].mxu0 }
 0x1f9   : > { %v1013_v47 = vshrl.u32 %v1012_v41, 23  ;;  %v1016_v3 = vand.u32 8388607, %v1009_v59  ;;  %v2276_v14 = vadd.f32 %v1548_v1, %v805_v48  ;;  %v896_v16 = vpop.f32.mrb[3].mxu0 }
 0x1fa   : > { %v909_v4 = vshrl.u32 %v908_v60, 23  ;;  %v912_v2 = vand.u32 8388607, %v905_v5  ;;  %v2281_v18 = vadd.f32 %v896_v16, %v800_v35 }
 0x1fb   : > { %v1505_v33 = vadd.s32 4294967169, %v1013_v47  ;;  %v1217_v30 = vand.u32 2147483647, %v2276_v14  ;;  %v1017_v51 = vor.u32 8388608, %v1016_v3  ;;  %v1220_v61 = vand.u32 2139095040, %v2276_v14 }
 0x1fc   : > { %v1501_v56 = vadd.s32 4294967169, %v909_v4  ;;  %v913_v26 = vor.u32 8388608, %v912_v2  ;;  %v1113_v20 = vand.u32 2147483647, %v2281_v18  ;;  %v1116_v0 = vand.u32 2139095040, %v2281_v18 }
 0x1fd   : > { %v1019_v7 = vadd.s32 1, %v1505_v33  ;;  %v1221_v17 = vshrl.u32 %v1220_v61, 23  ;;  %v2286_v10 = vand.u32 8388607, %v1217_v30  ;;  %v2289_v8 = vshll.u32 %v1017_v51, 8 }
 0x1fe   : > { %v915_v53 = vadd.s32 1, %v1501_v56  ;;  %v2291_v22 = vshll.u32 %v913_v26, 8 }
 0x1ff   : > { %vm1020_vm8 = vcmp.gt.s32.totalorder %v1019_v7, 0  ;;  %v1513_v23 = vadd.s32 4294967169, %v1221_v17  ;;  %v1225_v29 = vor.u32 8388608, %v2286_v10 }
 0x200   : > { %v1021_v21 = vsel %vm1020_vm8, %v1019_v7, 0  ;;  %vm916_vm9 = vcmp.gt.s32.totalorder %v915_v53, 0 }
 0x201   : > { %v1022_v25 = vshrl.u32 %v1021_v21, 5  ;;  %v1023_v24 = vand.u32 31, %v1021_v21  ;;  %v917_v58 = vsel %vm916_vm9, %v915_v53, 0  ;;  %v2299_v36 = vadd.s32 1, %v1513_v23 }
 0x202   : > { %v2293_v37 = vshrl.u32 %v917_v58, 5  ;;  %v919_v38 = vand.u32 31, %v917_v58 }
 0x203   : > { %v1024_v52 = vsub.s32 32, %v1023_v24  ;;  %v1026_v42 = vshll.u32 %v1765_v32, %v1023_v24  ;;  %v1029_v11 = vshll.u32 %v1766_v40, %v1023_v24  ;;  %v1032_v12 = vshll.u32 %v1767_v43, %v1023_v24 }
 0x204   : > { %v1035_v9 = vshll.u32 %v1762_v13, %v1023_v24  ;;  %v1038_v39 = vshll.u32 %v1763_v15, %v1023_v24  ;;  %vm1041_vm10 = vcmp.lt.s32.totalorder %v1022_v25, 1  ;;  %vm1042_vm11 = vcmp.lt.s32.totalorder %v1022_v25, 2 }
 0x205   : > { %v1027_v63 = vshrl.u32 %v1766_v40, %v1024_v52  ;;  %v1030_v50 = vshrl.u32 %v1767_v43, %v1024_v52  ;;  %v1033_v44 = vshrl.u32 %v1762_v13, %v1024_v52  ;;  %v1025_v34 = vshrl.u32 %v1765_v32, %v1024_v52 }
 0x206   : > { %v1036_v46 = vshrl.u32 %v1763_v15, %v1024_v52  ;;  %v1039_v6 = vshrl.u32 %v1764_v28, %v1024_v52  ;;  %vm1043_vm12 = vcmp.lt.s32.totalorder %v1022_v25, 3  ;;  %v920_v35 = vsub.s32 32, %v919_v38 }
 0x207   : > { %v1028_v49 = vor.u32 %v1027_v63, %v1026_v42  ;;  %v1031_v27 = vor.u32 %v1030_v50, %v1029_v11  ;;  %v1034_v54 = vor.u32 %v1033_v44, %v1032_v12  ;;  %vm1044_vm13 = vcmp.lt.s32.totalorder %v1022_v25, 4 }
 0x208   : > { %v1037_v62 = vor.u32 %v1036_v46, %v1035_v9  ;;  %v1040_v55 = vor.u32 %v1039_v6, %v1038_v39  ;;  %v922_v31 = vshll.u32 %v1765_v32, %v919_v38  ;;  %v925_v4 = vshll.u32 %v1766_v40, %v919_v38 }
 0x209   : > { %v1045_v41 = vsel %vm1041_vm10, %v1025_v34, %v1028_v49  ;;  %v1046_v48 = vsel %vm1044_vm13, %v1034_v54, 2102212464  ;;  %v1049_v60 = vsel %vm1041_vm10, %v1028_v49, %v1031_v27  ;;  %v1053_v1 = vsel %vm1041_vm10, %v1031_v27, %v1034_v54 }
 0x20a   : > { %v1047_v47 = vsel %vm1043_vm12, %v1031_v27, %v1046_v48  ;;  %v1050_v3 = vsel %vm1044_vm13, %v1037_v62, 920167782  ;;  %v1054_v16 = vsel %vm1044_vm13, %v1040_v55, 1326507024  ;;  %v921_v51 = vshrl.u32 %v1765_v32, %v920_v35 }
 0x20b   : > { %v1051_v2 = vsel %vm1043_vm12, %v1034_v54, %v1050_v3  ;;  %v1055_v33 = vsel %vm1043_vm12, %v1037_v62, %v1054_v16  ;;  %v923_v56 = vshrl.u32 %v1766_v40, %v920_v35  ;;  %v1048_v61 = vsel %vm1042_vm11, %v1045_v41, %v1047_v47 }
 0x20c   : > { %v1052_v7 = vsel %vm1042_vm11, %v1049_v60, %v1051_v2  ;;  %v1056_v26 = vsel %vm1042_vm11, %v1053_v1, %v1055_v33  ;;  %v926_v53 = vshrl.u32 %v1767_v43, %v920_v35  ;;  %v928_v42 = vshll.u32 %v1767_v43, %v919_v38 }
 0x20d   : > { %v2325_v17 = vmul.u32.u64.low %v2289_v8, %v1056_v26  ;;  %v2326_v21 = vmul.u32.u64.high %v2289_v8, %v1056_v26, %v2325_v17  ;;  %v2329_v23 = vmul.u32.u64.low %v2289_v8, %v1052_v7  ;;  %v2330_v24 = vmul.u32.u64.high %v2289_v8, %v1052_v7, %v2329_v23 }
 0x20e   : > { %v924_v58 = vor.u32 %v923_v56, %v922_v31  ;;  %v927_v52 = vor.u32 %v926_v53, %v925_v4  ;;  %v929_v11 = vshrl.u32 %v1762_v13, %v920_v35  ;;  %v1064_v25 = vmul.u32 %v2289_v8, %v1048_v61 }
 0x20f   : > { %v931_v12 = vshll.u32 %v1762_v13, %v919_v38  ;;  %v932_v9 = vshrl.u32 %v1763_v15, %v920_v35  ;;  %v935_v39 = vshrl.u32 %v1764_v28, %v920_v35  ;;  %v934_v50 = vshll.u32 %v1763_v15, %v919_v38 }
 0x210   : > { %v930_v63 = vor.u32 %v929_v11, %v928_v42  ;;  %vm937_vm14 = vcmp.lt.s32.totalorder %v2293_v37, 1  ;;  %vm938_vm15 = vcmp.lt.s32.totalorder %v2293_v37, 2  ;;  %vm1066_vm0 = vc.u32 %v2326_v21, %v2329_v23 }
 0x211   : > { %v1067_v44 = vadd.s32 1, %v2330_v24  ;;  %v933_v34 = vor.u32 %v932_v9, %v931_v12  ;;  %vm939_vm2 = vcmp.lt.s32.totalorder %v2293_v37, 3  ;;  %v936_v8 = vor.u32 %v935_v39, %v934_v50 }
 0x212   : > { %vm940_vm3 = vcmp.lt.s32.totalorder %v2293_v37, 4  ;;  %v941_v46 = vsel %vm937_vm14, %v921_v51, %v924_v58  ;;  %v945_v6 = vsel %vm937_vm14, %v924_v58, %v927_v52  ;;  %v949_v54 = vsel %vm937_vm14, %v927_v52, %v930_v63 }
 0x213   : > { %v1068_v49 = vsel %vm1066_vm0, %v1067_v44, %v2330_v24  ;;  %v942_v38 = vsel %vm940_vm3, %v930_v63, 2102212464  ;;  %v946_v27 = vsel %vm940_vm3, %v933_v34, 920167782  ;;  %v950_v31 = vsel %vm940_vm3, %v936_v8, 1326507024 }
 0x214   : > { %v1069_v35 = vadd.s32 %v1068_v49, %v1064_v25  ;;  %v943_v62 = vsel %vm939_vm2, %v927_v52, %v942_v38  ;;  %v947_v55 = vsel %vm939_vm2, %v930_v63, %v946_v27  ;;  %v951_v60 = vsel %vm939_vm2, %v933_v34, %v950_v31 }
 0x215   : > { %v944_v41 = vsel %vm938_vm15, %v941_v46, %v943_v62  ;;  %v948_v48 = vsel %vm938_vm15, %v945_v6, %v947_v55  ;;  %vm1228_vm4 = vcmp.gt.s32.totalorder %v2299_v36, 0  ;;  %v952_v47 = vsel %vm938_vm15, %v949_v54, %v951_v60 }
 0x216   : > { %v1070_v1 = vadd.s32 536870912, %v1069_v35  ;;  %v2356_v3 = vmul.u32.u64.low %v2291_v22, %v948_v48  ;;  %v2357_v16 = vmul.u32.u64.high %v2291_v22, %v948_v48, %v2356_v3  ;;  %v1229_v33 = vsel %vm1228_vm4, %v2299_v36, 0 }
 0x217   : > { %v2361_v4 = vmul.u32.u64.low %v2291_v22, %v952_v47  ;;  %v2362_v2 = vmul.u32.u64.high %v2291_v22, %v952_v47, %v2361_v4  ;;  %v1117_v51 = vshrl.u32 %v1116_v0, 23  ;;  %v1231_v61 = vand.u32 31, %v1229_v33 }
 0x218   : > { %v2367_v56 = vshrl.u32 %v1070_v1, 30  ;;  %v960_v37 = vmul.u32 %v2291_v22, %v944_v41  ;;  %v2372_v7 = vshll.u32 %v1225_v29, 8  ;;  %v2376_v26 = vand.u32 8388607, %v1113_v20 }
 0x219   : > { %v963_v36 = vadd.s32 1, %v2357_v16  ;;  %v1230_v17 = vshrl.u32 %v1229_v33, 5  ;;  %v1232_v24 = vsub.s32 32, %v1231_v61  ;;  %vm962_vm5 = vc.u32 %v2362_v2, %v2356_v3 }
 0x21a   : > { %v1072_v53 = vshll.u32 %v2367_v56, 30  ;;  %v1234_v0 = vshll.u32 %v1765_v32, %v1231_v61  ;;  %v1237_v22 = vshll.u32 %v1766_v40, %v1231_v61  ;;  %v1509_v10 = vadd.s32 4294967169, %v1117_v51 }
 0x21b   : > { %v964_v58 = vsel %vm962_vm5, %v963_v36, %v2357_v16  ;;  %v1235_v52 = vshrl.u32 %v1766_v40, %v1232_v24  ;;  %v1240_v42 = vshll.u32 %v1767_v43, %v1231_v61  ;;  %v1238_v25 = vshrl.u32 %v1767_v43, %v1232_v24 }
 0x21c   : > { %v2384_v29 = vsub.s32 %v1069_v35, %v1072_v53  ;;  %v965_v11 = vadd.s32 %v964_v58, %v960_v37  ;;  %v1241_v12 = vshrl.u32 %v1762_v13, %v1232_v24  ;;  %v1243_v9 = vshll.u32 %v1762_v13, %v1231_v61 }
 0x21d   : > { %v1236_v63 = vor.u32 %v1235_v52, %v1234_v0  ;;  %v1244_v50 = vshrl.u32 %v1763_v15, %v1232_v24  ;;  %v1246_v44 = vshll.u32 %v1763_v15, %v1231_v61  ;;  %v1239_v8 = vor.u32 %v1238_v25, %v1237_v22 }
 0x21e   : > { %v1075_v39 = vsub.s32 0, %v2384_v29  ;;  %v966_v34 = vadd.s32 536870912, %v965_v11  ;;  %v1242_v46 = vor.u32 %v1241_v12, %v1240_v42  ;;  %v1247_v6 = vshrl.u32 %v1764_v28, %v1232_v24 }
 0x21f   : > { %v1233_v38 = vshrl.u32 %v1765_v32, %v1232_v24  ;;  %v1245_v27 = vor.u32 %v1244_v50, %v1243_v9  ;;  %vm1249_vm6 = vcmp.lt.s32.totalorder %v1230_v17, 1  ;;  %vm1251_vm7 = vcmp.lt.s32.totalorder %v1230_v17, 3 }
 0x220   : > { %v1506_v49 = vmin.u32 %v1075_v39, %v2384_v29  ;;  %v967_v54 = vshrl.u32 %v966_v34, 30  ;;  %v1248_v35 = vor.u32 %v1247_v6, %v1246_v44  ;;  %vm1252_vm8 = vcmp.lt.s32.totalorder %v1230_v17, 4 }
 0x221   : > { %v1253_v55 = vsel %vm1249_vm6, %v1233_v38, %v1236_v63  ;;  %v1254_v31 = vsel %vm1252_vm8, %v1242_v46, 2102212464  ;;  %v1257_v41 = vsel %vm1249_vm6, %v1236_v63, %v1239_v8  ;;  %v1258_v1 = vsel %vm1252_vm8, %v1245_v27, 920167782 }
 0x222   : > { %v1077_v62 = vclz %v1506_v49  ;;  %v968_v48 = vshll.u32 %v967_v54, 30  ;;  %v1255_v60 = vsel %vm1251_vm7, %v1239_v8, %v1254_v31  ;;  %v1261_v47 = vsel %vm1249_vm6, %v1239_v8, %v1242_v46 }
 0x223   : > { %vm1250_vm9 = vcmp.lt.s32.totalorder %v1230_v17, 2  ;;  %v1259_v4 = vsel %vm1251_vm7, %v1242_v46, %v1258_v1  ;;  %v1262_v33 = vsel %vm1252_vm8, %v1248_v35, 1326507024  ;;  %v1123_v12 = vadd.s32 1, %v1509_v10 }
 0x224   : > { %v1507_v16 = vadd.s32 4294967294, %v1077_v62  ;;  %v2400_v51 = vsub.s32 %v965_v11, %v968_v48  ;;  %v1256_v61 = vsel %vm1250_vm9, %v1253_v55, %v1255_v60  ;;  %v1260_v37 = vsel %vm1250_vm9, %v1257_v41, %v1259_v4 }
 0x225   : > { %v1263_v53 = vsel %vm1251_vm7, %v1245_v27, %v1262_v33  ;;  %v2404_v24 = vmul.u32.u64.low %v2372_v7, %v1260_v37  ;;  %v2405_v0 = vmul.u32.u64.high %v2372_v7, %v1260_v37, %v2404_v24  ;;  %v1065_v11 = vadd.s32 %v2329_v23, %v2326_v21 }
 0x226   : > { %vm1508_vm10 = vcmp.lt.s32.totalorder %v1507_v16, 0  ;;  %v1264_v36 = vsel %vm1250_vm9, %v1261_v47, %v1263_v53  ;;  %v971_v58 = vsub.s32 0, %v2400_v51  ;;  %v1272_v63 = vmul.u32 %v2372_v7, %v1256_v61 }
 0x227   : > { %v1080_v22 = vsel %vm1508_vm10, 0, %v1507_v16  ;;  %v2410_v52 = vmul.u32.u64.low %v2372_v7, %v1264_v36  ;;  %v2411_v42 = vmul.u32.u64.high %v2372_v7, %v1264_v36, %v2410_v52  ;;  %v1121_v50 = vor.u32 8388608, %v2376_v26 }
 0x228   : > { %v1081_v25 = vsub.s32 32, %v1080_v22  ;;  %v1085_v17 = vsub.s32 4294967266, %v1080_v22  ;;  %v1082_v9 = vshll.u32 %v2384_v29, %v1080_v22  ;;  %v1502_v39 = vmin.u32 %v971_v58, %v2400_v51 }
 0x229   : > { %v1275_v8 = vadd.s32 1, %v2405_v0  ;;  %vm1124_vm11 = vcmp.gt.s32.totalorder %v1123_v12, 0  ;;  %vm1274_vm12 = vc.u32 %v2411_v42, %v2404_v24  ;;  %v991_v23 = vsub.s32 4, %v967_v54 }
 0x22a   : > { %v1083_v44 = vshrl.u32 %v1065_v11, %v1081_v25  ;;  %v1086_v34 = vadd.s32 127, %v1085_v17  ;;  %v973_v46 = vclz %v1502_v39  ;;  %v1125_v21 = vsel %vm1124_vm11, %v1123_v12, 0 }
 0x22b   : > { %vm907_vm13 = vcmp.lt.s32.totalorder %v2268_v19, 0  ;;  %v1276_v29 = vsel %vm1274_vm12, %v1275_v8, %v2405_v0  ;;  %v961_v7 = vadd.s32 %v2356_v3, %v2362_v2  ;;  %v1127_v38 = vand.u32 31, %v1125_v21 }
 0x22c   : > { %v1084_v10 = vor.u32 %v1083_v44, %v1082_v9  ;;  %v1087_v6 = vshll.u32 %v1086_v34, 23  ;;  %v1503_v26 = vadd.s32 4294967294, %v973_v46  ;;  %v1277_v49 = vadd.s32 %v1276_v29, %v1272_v63 }
 0x22d   : > { %v2426_v35 = vshrl.u32 %v1125_v21, 5  ;;  %v2428_v62 = vshll.u32 %v1121_v50, 8  ;;  %v1095_v55 = vsub.s32 4, %v2367_v56  ;;  %v1128_v41 = vsub.s32 32, %v1127_v38 }
 0x22e   : > { %v1088_v27 = vor.u32 4788187, %v1087_v6  ;;  %vm1504_vm14 = vcmp.lt.s32.totalorder %v1503_v26, 0  ;;  %v1278_v31 = vadd.s32 536870912, %v1277_v49  ;;  %v2433_v48 = vsel %vm907_vm13, %v991_v23, %v967_v54 }
 0x22f   : > { %v1091_v1 = vcvt.s32.f32 %v1084_v10  ;;  %v976_v3 = vsel %vm1504_vm14, 0, %v1503_v26  ;;  %v1130_v2 = vshll.u32 %v1765_v32, %v1127_v38  ;;  %v1133_v33 = vshll.u32 %v1766_v40, %v1127_v38 }
 0x230   : > { %v1089_v60 = vand.u32 2147483647, %v1088_v27  ;;  %v977_v47 = vsub.s32 32, %v976_v3  ;;  %v981_v16 = vsub.s32 4294967266, %v976_v3  ;;  %v2436_v4 = vshrl.u32 %v1278_v31, 30 }
 0x231   : > { %v978_v37 = vshll.u32 %v2400_v51, %v976_v3  ;;  %v1131_v53 = vshrl.u32 %v1766_v40, %v1128_v41  ;;  %v1134_v36 = vshrl.u32 %v1767_v43, %v1128_v41  ;;  %vm1011_vm15 = vcmp.lt.s32.totalorder %v2266_v57, 0 }
 0x232   : > { %v1092_v61 = vmul.f32 %v1091_v1, %v1089_v60  ;;  %v979_v54 = vshrl.u32 %v961_v7, %v977_v47  ;;  %v982_v0 = vadd.s32 127, %v981_v16  ;;  %v1280_v22 = vshll.u32 %v2436_v4, 30 }
 0x233   : > { %v1137_v58 = vshrl.u32 %v1762_v13, %v1128_v41  ;;  %v1132_v52 = vor.u32 %v1131_v53, %v1130_v2  ;;  %v1135_v11 = vor.u32 %v1134_v36, %v1133_v33  ;;  %v1136_v25 = vshll.u32 %v1767_v43, %v1127_v38 }
 0x234   : > { %vm1145_vm0 = vcmp.lt.s32.totalorder %v2426_v35, 1  ;;  %v980_v17 = vor.u32 %v979_v54, %v978_v37  ;;  %v983_v51 = vshll.u32 %v982_v0, 23  ;;  %v2447_v12 = vsub.s32 %v1277_v49, %v1280_v22 }
 0x235   : > { %v1139_v40 = vshll.u32 %v1762_v13, %v1127_v38  ;;  %v1138_v9 = vor.u32 %v1137_v58, %v1136_v25  ;;  %v1140_v39 = vshrl.u32 %v1763_v15, %v1128_v41  ;;  %v1142_v63 = vshll.u32 %v1763_v15, %v1127_v38 }
 0x236   : > { %v1143_v50 = vshrl.u32 %v1764_v28, %v1128_v41  ;;  %v1093_v44 = vxor.u32 2147483648, %v1092_v61  ;;  %v984_v34 = vor.u32 4788187, %v983_v51  ;;  %v1283_v8 = vsub.s32 0, %v2447_v12 }
 0x237   : > { %v1129_v43 = vshrl.u32 %v1765_v32, %v1128_v41  ;;  %v987_v46 = vcvt.s32.f32 %v980_v17  ;;  %v1141_v21 = vor.u32 %v1140_v39, %v1139_v40  ;;  %vm1147_vm2 = vcmp.lt.s32.totalorder %v2426_v35, 3 }
 0x238   : > { %v1144_v23 = vor.u32 %v1143_v50, %v1142_v63  ;;  %v985_v10 = vand.u32 2147483647, %v984_v34  ;;  %v1514_v13 = vmin.u32 %v1283_v8, %v2447_v12  ;;  %vm1148_vm3 = vcmp.lt.s32.totalorder %v2426_v35, 4 }
 0x239   : > { %v1153_v15 = vsel %vm1145_vm0, %v1132_v52, %v1135_v11  ;;  %v1150_v28 = vsel %vm1148_vm3, %v1138_v9, 2102212464  ;;  %v1154_v6 = vsel %vm1148_vm3, %v1141_v21, 920167782  ;;  %v1157_v29 = vsel %vm1145_vm0, %v1135_v11, %v1138_v9 }
 0x23a   : > { %v1158_v7 = vsel %vm1148_vm3, %v1144_v23, 1326507024  ;;  %v988_v32 = vmul.f32 %v987_v46, %v985_v10  ;;  %v1285_v26 = vclz %v1514_v13  ;;  %vm1146_vm4 = vcmp.lt.s32.totalorder %v2426_v35, 2 }
 0x23b   : > { %v1155_v49 = vsel %vm1147_vm2, %v1138_v9, %v1154_v6  ;;  %v1094_v38 = vsel %vm1011_vm15, %v1093_v44, %v1092_v61  ;;  %v1149_v27 = vsel %vm1145_vm0, %v1129_v43, %v1132_v52  ;;  %v1159_v41 = vsel %vm1147_vm2, %v1141_v21, %v1158_v7 }
 0x23c   : > { %v1156_v31 = vsel %vm1146_vm4, %v1153_v15, %v1155_v49  ;;  %v989_v60 = vxor.u32 2147483648, %v988_v32  ;;  %v1515_v1 = vadd.s32 4294967294, %v1285_v26  ;;  %v1151_v3 = vsel %vm1147_vm2, %v1135_v11, %v1150_v28 }
 0x23d   : > { %v1160_v2 = vsel %vm1146_vm4, %v1157_v29, %v1159_v41  ;;  %v2482_v33 = vmul.u32.u64.low %v2428_v62, %v1156_v31  ;;  %v2483_v61 = vmul.u32.u64.high %v2428_v62, %v1156_v31, %v2482_v33  ;;  %vm2490_vm6 = vcmp.le.f32.partialorder %v905_v5, 0.7853982 }
 0x23e   : > { %v2478_v47 = vmul.u32.u64.low %v2428_v62, %v1160_v2  ;;  %v2479_v16 = vmul.u32.u64.high %v2428_v62, %v1160_v2, %v2478_v47  ;;  %v990_v37 = vsel %vm907_vm13, %v989_v60, %v988_v32  ;;  %vm1516_vm5 = vcmp.lt.s32.totalorder %v1515_v1, 0 }
 0x23f   : > { %v1288_v36 = vsel %vm1516_vm5, 0, %v1515_v1  ;;  %v1152_v54 = vsel %vm1146_vm4, %v1149_v27, %v1151_v3  ;;  %v993_v0 = vsel %vm2490_vm6, %v2268_v19, %v990_v37  ;;  %vm2501_vm7 = vcmp.le.f32.partialorder %v1009_v59, 0.7853982 }
 0x240   : > { %v1293_v58 = vsub.s32 4294967266, %v1288_v36  ;;  %v994_v5 = vsel %vm2490_vm6, 0, %v2433_v48  ;;  %1680 = vcosq.f32 %v993_v0  ;;  %v1097_v35 = vsel %vm2501_vm7, %v2266_v57, %v1094_v38 }
 0x241   : > { %vm1170_vm8 = vc.u32 %v2479_v16, %v2482_v33  ;;  %v1171_v52 = vadd.s32 1, %v2483_v61  ;;  %1682 = vsinq.f32 %v993_v0  ;;  %v1096_v59 = vsel %vm1011_vm15, %v1095_v55, %v2367_v56 }
 0x242   : > { %v1289_v11 = vsub.s32 32, %v1288_v36  ;;  %v1294_v25 = vadd.s32 127, %v1293_v58  ;;  %v1168_v48 = vmul.u32 %v2428_v62, %v1152_v54  ;;  %v1273_v17 = vadd.s32 %v2404_v24, %v2411_v42 }
 0x243   : > { %v1172_v51 = vsel %vm1170_vm8, %v1171_v52, %v2483_v61  ;;  %v998_v40 = vadd.s32 3, %v994_v5  ;;  %1684 = vcosq.f32 %v1097_v35  ;;  %v1098_v63 = vsel %vm2501_vm7, 0, %v1096_v59 }
 0x244   : > { %v1295_v9 = vshll.u32 %v1294_v25, 23  ;;  %v1173_v39 = vadd.s32 %v1172_v51, %v1168_v48  ;;  %1686 = vsinq.f32 %v1097_v35  ;;  %v1291_v50 = vshrl.u32 %v1273_v17, %v1289_v11 }
 0x245   : > { %vm1769_vm9 = vmmov 0   ;;  %v1770_v56 = vmov 0.0   ;;  %v1102_v55 = vadd.s32 3, %v1098_v63  ;;  %v1290_v62 = vshll.u32 %v2447_v12, %v1288_v36 }
 0x246   : > { %v1174_v44 = vadd.s32 536870912, %v1173_v39  ;;  %1557 = vmatprep.mubr.msk.f32.mxu1 %vm1769_vm9, %v1770_v56  ;;  %v1296_v34 = vor.u32 4788187, %v1295_v9  ;;  %v999_v42 = vand.u32 3, %v998_v40  ;;  %vm997_vm13 = vweird.f32 %v2268_v19 }
 0x247   : > { %v1292_v43 = vor.u32 %v1291_v50, %v1290_v62  ;;  %v1103_v10 = vand.u32 3, %v1102_v55  ;;  %vm1101_vm2 = vweird.f32 %v2266_v57  ;;  %vm1219_vm4 = vcmp.lt.s32.totalorder %v2276_v14, 0 }
 0x248   : > { %v2526_v24 = vshrl.u32 %v1174_v44, 30  ;;  %v1297_v13 = vand.u32 2147483647, %v1296_v34  ;;  %vm1004_vm10 = vcmp.eq.s32.totalorder %v999_v42, 2  ;;  %vm1000_vm11 = vcmp.lt.s32.totalorder %v999_v42, 2 }
 0x249   : > { %vm1001_vm12 = vcmp.eq.s32.totalorder %v999_v42, 0  ;;  %v1299_v7 = vcvt.s32.f32 %v1292_v43  ;;  %vm1108_vm14 = vcmp.eq.s32.totalorder %v1103_v10, 2  ;;  %vm1105_vm15 = vcmp.eq.s32.totalorder %v1103_v10, 0 }
 0x24a   : > { %v1681_v8 = vpop.eup %1680  ;;  %v1176_v46 = vshll.u32 %v2526_v24, 30  ;;  %vm1104_vm0 = vcmp.lt.s32.totalorder %v1103_v10, 2  ;;  %v1169_v0 = vadd.s32 %v2482_v33, %v2479_v16  ;;  %vm2539_vm5 = vcmp.le.f32.partialorder %v1217_v30, 0.7853982 }
 0x24b   : > { %v1683_v21 = vpop.eup %1682  ;;  %v1005_v23 = vxor.u32 2147483648, %v1681_v8  ;;  %v1300_v31 = vmul.f32 %v1299_v7, %v1297_v13  ;;  %v1303_v25 = vsub.s32 4, %v2436_v4  ;;  %v1199_v51 = vsub.s32 4, %v2526_v24 }
 0x24c   : > { %v1177_v15 = vsub.s32 %v1173_v39, %v1176_v46  ;;  %v1002_v28 = vxor.u32 2147483648, %v1683_v21  ;;  %vm1115_vm6 = vcmp.lt.s32.totalorder %v2281_v18, 0  ;;  %vm1114_vm7 = vcmp.le.f32.partialorder %v1113_v20, 0.7853982 }
 0x24d   : > { %v1685_v6 = vpop.eup %1684  ;;  %v1006_v29 = vsel %vm1004_vm10, %v1005_v23, %v1683_v21  ;;  %v1301_v37 = vxor.u32 2147483648, %v1300_v31  ;;  %v1304_v30 = vsel %vm1219_vm4, %v1303_v25, %v2436_v4  ;;  %v1200_v63 = vsel %vm1115_vm6, %v1199_v51, %v2526_v24 }
 0x24e   : > { %v1687_v12 = vpop.eup %1686  ;;  %v1179_v32 = vsub.s32 0, %v1177_v15  ;;  %v1003_v26 = vsel %vm1001_vm12, %v1681_v8, %v1002_v28  ;;  %v1109_v49 = vxor.u32 2147483648, %v1685_v6  ;;  %v1306_v9 = vsel %vm2539_vm5, 0, %v1304_v30 }
 0x24f   : > { %v1007_v38 = vsel %vm1000_vm11, %v1003_v26, %v1006_v29  ;;  %v1106_v27 = vxor.u32 2147483648, %v1687_v12  ;;  %v1302_v54 = vsel %vm1219_vm4, %v1301_v37, %v1300_v31  ;;  %v1310_v44 = vadd.s32 3, %v1306_v9 }
 0x250   : > { %v1510_v41 = vmin.u32 %v1179_v32, %v1177_v15  ;;  %v1110_v60 = vsel %vm1108_vm14, %v1109_v49, %v1687_v12  ;;  %v1008_v1 = vsel %vm997_vm13, nan, %v1007_v38  ;;  %v1202_v55 = vsel %vm1114_vm7, 0, %v1200_v63  ;;  %v1321_v32 = vld [vmem:[%s2616_s5] sm:$0x7] }
 0x251   : > { %v1107_v3 = vsel %vm1105_vm15, %v1685_v6, %v1106_v27  ;;  %v1311_v62 = vand.u32 3, %v1310_v44  ;;  %v1206_v34 = vadd.s32 3, %v1202_v55  ;;  %vm1309_vm13 = vweird.f32 %v2276_v14 }
 0x252   : > { %v1181_v2 = vclz %v1510_v41  ;;  %v1111_v47 = vsel %vm1104_vm0, %v1107_v3, %v1110_v60  ;;  %vm1205_vm15 = vweird.f32 %v2281_v18 }
 0x253   : > { %v1112_v61 = vsel %vm1101_vm2, nan, %v1111_v47  ;;  %vm1313_vm8 = vcmp.eq.s32.totalorder %v1311_v62, 0  ;;  %vm1316_vm9 = vcmp.eq.s32.totalorder %v1311_v62, 2  ;;  %v1207_v43 = vand.u32 3, %v1206_v34 }
 0x254   : > { %v1511_v53 = vadd.s32 4294967294, %v1181_v2  ;;  %v1569_v36 = vpack.c.bf16 %v1112_v61, %v1008_v1  ;;  %vm1312_vm10 = vcmp.lt.s32.totalorder %v1311_v62, 2 }
 0x255   : > { %vm1212_vm11 = vcmp.eq.s32.totalorder %v1207_v43, 2  ;;  %vm1209_vm12 = vcmp.eq.s32.totalorder %v1207_v43, 0  ;;  %vm1208_vm14 = vcmp.lt.s32.totalorder %v1207_v43, 2 }
 0x256   : > { %vm1512_vm3 = vcmp.lt.s32.totalorder %v1511_v53, 0  ;;  %1570 = vmatpush3.bf16.msra.mxu1 %v1569_v36 }
 0x257   : > { %v1184_v19 = vsel %vm1512_vm3, 0, %v1511_v53  ;;  %1571 = vmatprep.subr.bf16.mxu1 %v1768_v45  ;;  %v1305_v45 = vsel %vm2539_vm5, %v2276_v14, %v1302_v54  ;;  %v1326_v14 = vpop.permute.xlu0 %1325 }
 0x258   : > { %v1185_v22 = vsub.s32 32, %v1184_v19  ;;  %v1189_v57 = vsub.s32 4294967266, %v1184_v19  ;;  %v1186_v5 = vshll.u32 %v1177_v15, %v1184_v19  ;;  %1688 = vcosq.f32 %v1305_v45 }
 0x259   : > { %1690 = vsinq.f32 %v1305_v45 }
 0x25a   : > { %v1187_v35 = vshrl.u32 %v1169_v0, %v1185_v22  ;;  %v1190_v52 = vadd.s32 127, %v1189_v57 }
 0x25c   : > { %v1188_v59 = vor.u32 %v1187_v35, %v1186_v5  ;;  %v1191_v11 = vshll.u32 %v1190_v52, 23 }
 0x25e   : > { %v1192_v16 = vor.u32 4788187, %v1191_v11  ;;  %v1195_v48 = vcvt.s32.f32 %v1188_v59 }
 0x260   : > { %v1193_v33 = vand.u32 2147483647, %v1192_v16 }
 0x262   : > { %v1196_v17 = vmul.f32 %v1195_v48, %v1193_v33  ;;  %v1689_v56 = vpop.eup %1688 }
 0x263   : > { %v1691_v4 = vpop.eup %1690  ;;  %v1317_v8 = vxor.u32 2147483648, %v1689_v56 }
 0x264   : > { %v1197_v40 = vxor.u32 2147483648, %v1196_v17  ;;  %v1314_v42 = vxor.u32 2147483648, %v1691_v4 }
 0x265   : > { %v1318_v20 = vsel %vm1316_vm9, %v1317_v8, %v1691_v4 }
 0x266   : > { %v1198_v39 = vsel %vm1115_vm6, %v1197_v40, %v1196_v17  ;;  %v1315_v46 = vsel %vm1313_vm8, %v1689_v56, %v1314_v42 }
 0x267   : > { %v1201_v50 = vsel %vm1114_vm7, %v2281_v18, %v1198_v39  ;;  %v1319_v10 = vsel %vm1312_vm10, %v1315_v46, %v1318_v20 }
 0x268   : > { %1692 = vcosq.f32 %v1201_v50  ;;  %v1320_v6 = vsel %vm1309_vm13, nan, %v1319_v10 }
 0x269   : > { %1694 = vsinq.f32 %v1201_v50 }
 0x272   : > { %v1693_v21 = vpop.eup %1692 }
 0x273   : > { %v1695_v24 = vpop.eup %1694  ;;  %v1213_v23 = vxor.u32 2147483648, %v1693_v21 }
 0x274   : > { %v1210_v13 = vxor.u32 2147483648, %v1695_v24 }
 0x275   : > { %v1214_v15 = vsel %vm1212_vm11, %v1213_v23, %v1695_v24 }
 0x276   : > { %v1211_v28 = vsel %vm1209_vm12, %v1693_v21, %v1210_v13 }
 0x277   : > { %v1215_v29 = vsel %vm1208_vm14, %v1211_v28, %v1214_v15 }
 0x278   : > { %v1216_v12 = vsel %vm1205_vm15, nan, %v1215_v29 }
 0x279   : > { %v1572_v7 = vpack.c.bf16 %v1320_v6, %v1216_v12 }
 0x27b   : > { %1573 = vmatpush3.bf16.msra.mxu1 %v1572_v7 }
 0x27e   : > { %1558 = vmatmul.mubr.msk.f32.vlgmr.msra.gmra.mrb[0].mxu1 %vm807_vm1, %v1321_v32 }
 0x351   : > { %v1397_v26 = vpop.f32.mrb[0].mxu1 }
 0x352   : > { %v1398_v49 = vadd.f32 %v1397_v26, %v1326_v14  ;;  %v1559_v18 = vpop.f32.mrb[1].mxu1 }
 0x354   : > { %1401 = vst [vmem:[%s269_s15] sm:$0x7] %v1398_v49 }
 0x355   : > { %1709 = shalt.err (!%p1706_p3)
}
 0x356   : > { %s1710_s29 = scalar_lea.hbm %s2569_s19, 64  ;;  %s1714_s13 = scalar_lea.hbm %s2618_s7, 128 }
 0x357   : > { %p1711_p4 = scmp.ne.s32.totalorder %s2569_s19, %s1710_s29  ;;  %p1715_p9 = scmp.lt.u32.totalorder %s2569_s19, %s2618_s7 }
 0x358   : > { %p1716_p10 = scmp.lt.u32.totalorder %s1714_s13, %s1710_s29  ;;  %p1718_p12 = scmp.lt.u32.totalorder %s1710_s29, %s2569_s19 }
 0x359   : > { %p1712_p7 = pnand %p1711_p4, %p1850_p5 }
 0x35a   : > { %p1717_p11 = por %p1716_p10, %p1715_p9 }
 0x35b   : > { %p1713_p8 = pneg %p1712_p7 }
 0x35c   : > { %p1719_p13 = por %p1718_p12, %p1717_p11 }
 0x35e   : > { %p1720_p0 = pnand %p1719_p13, %p1713_p8 }
 0x360   : > { %1723 = shalt.err (!%p1720_p0)
}
 0x361   : > { %1606 = dma.vmem_to_hbm [thread:$0]  (%p1850_p5), %s2571_s16, 64, %s2569_s19, %s1403_s20  }
 0x362 PF: > { %p1612_p1 = scmp.ge.s32.totalorder %s1758_s27, 2  ;;  %s1428_s17 = sand.u32 1, %s1746_s24  }
 0x363   : > { %s1429_s18 = scalar_lea.sflag [#allocation3], %s1428_s17 }
 0x364   : > { %p1609_p2 = pnand %p1612_p1, %p1854_p6 }
 0x366   : > { %1741 = dma.done.wait (!%p1609_p2), %s1429_s18, 64  }
 0x367   : > { %1743 = vsyncadd (!%p1609_p2), %s1429_s18, 4294967232  ;;  %p17_p3 = scmp.ge.s32.totalorder %s1837_s30, 4   ;;  %s2633_s24 = smov %s1750_s25 }
 0x368   : > { %s2634_s25 = smov %s1754_s26  ;;  %s2635_s26 = smov %s1848_s10 }
 0x369   : > { %s2636_s27 = smov %s1837_s30  ;;  %19 = sbr.rel (!%p17_p3) target bundleno = 3 (0x3), region = 83 }
 0x370   :  { %1434 = vsyncpa [#allocation3], 1 }
 0x371   :  { %1436 = vsyncpa [#allocation3 + $0x1], 1 }

</bundles_post_ra>
